<compile_context>
chip_gen: v7x
topology: tpu7x:2x2x1
jax: 0.10.0
libtpu: 0.0.40
codegen_flags: <defaults>
</compile_context>

<pallas_src>
import jax
import jax.numpy as jnp
from jax import lax
from jax.experimental import pallas as pl
from jax.experimental.pallas import tpu as pltpu


# ----------------------------------------------------------------------------
# Kernel: one image per grid step, everything VMEM-resident.
# ----------------------------------------------------------------------------
def _lenet_kernel(x_ref, a1_ref, b1_ref, se28_ref, so28_ref, p1e_ref, p1o_ref,
                  a2_ref, b2_ref, se10_ref, so10_ref, p2e_ref, p2o_ref,
                  a3_ref, b3_ref, f1w_ref, f1b_ref, f2w_ref, f2b_ref, out_ref):
    f32 = jnp.float32

    def dot(a, b):
        return jnp.dot(a, b, preferred_element_type=f32)

    xv = x_ref[0, :, :]                                   # (32, 32) padded input

    # ---- conv1 (1->6, k5, pad2) as banded matmuls: (28,32)@(32,168) x5 ------
    acc = dot(xv[0:28, :], a1_ref[0])
    for i in range(1, 5):
        acc = acc + dot(xv[i:i + 28, :], a1_ref[i])
    h1 = jnp.maximum(acc + b1_ref[...], 0.0)              # (28, 168)  [H, W*6]

    # ---- pool1 (2x2, stride 2): row-select matmuls + lane-block selects -----
    r1 = jnp.maximum(dot(se28_ref[...], h1), dot(so28_ref[...], h1))   # (14,168)
    p1 = jnp.maximum(dot(r1, p1e_ref[...]), dot(r1, p1o_ref[...]))     # (14, 84)

    # ---- conv2 (6->16, k5): (10,84)@(84,160) x5 ------------------------------
    acc = dot(p1[0:10, :], a2_ref[0])
    for i in range(1, 5):
        acc = acc + dot(p1[i:i + 10, :], a2_ref[i])
    h2 = jnp.maximum(acc + b2_ref[...], 0.0)              # (10, 160) [H, W*16]

    # ---- pool2 ---------------------------------------------------------------
    r2 = jnp.maximum(dot(se10_ref[...], h2), dot(so10_ref[...], h2))   # (5,160)
    p2 = jnp.maximum(dot(r2, p2e_ref[...]), dot(r2, p2o_ref[...]))     # (5, 80)

    # ---- conv3 (16->120, k5, output 1x1): (1,80)@(80,120) x5 ----------------
    acc = dot(p2[0:1, :], a3_ref[0])
    for i in range(1, 5):
        acc = acc + dot(p2[i:i + 1, :], a3_ref[i])
    h3 = jnp.maximum(acc + b3_ref[...], 0.0)              # (1, 120)

    # ---- fc1 (120->84) + ReLU -------------------------------------------------
    h4 = jnp.maximum(dot(h3, f1w_ref[...]) + f1b_ref[...], 0.0)        # (1, 84)

    # ---- fc2 (84->10) + softmax ------------------------------------------------
    logits = dot(h4, f2w_ref[...]) + f2b_ref[...]                      # (1, 10)
    m = jnp.max(logits, axis=-1, keepdims=True)
    e = jnp.exp(logits - m)
    out_ref[0] = e / jnp.sum(e, axis=-1, keepdims=True)


# ----------------------------------------------------------------------------
# Host-side (jit'ed) weight repacking helpers — one-time glue.
# ----------------------------------------------------------------------------
def _conv_band(w, w_in, w_out):
    """(Cout, Cin, KH, KW) conv weights -> (KH, W_in*Cin, W_out*Cout) band mats.

    A[i][wc*Cin + ci, ow*Cout + co] = w[co, ci, i, wc - ow]  if 0 <= wc-ow < KW.
    With activations laid out (H, W*Cin), the conv output row oh is
        sum_i  act[oh + i, :] @ A[i]      -> layout (H_out, W_out*Cout).
    """
    co, ci, kh, kw = w.shape
    wt = jnp.transpose(w.astype(jnp.float32), (2, 3, 1, 0))    # (kh, kw, ci, co)
    col = jnp.arange(w_in)[:, None]
    ow = jnp.arange(w_out)[None, :]
    j = col - ow                                               # (w_in, w_out)
    valid = (j >= 0) & (j < kw)
    jc = jnp.clip(j, 0, kw - 1)
    a = wt[:, jc, :, :]                                        # (kh,w_in,w_out,ci,co)
    a = jnp.where(valid[None, :, :, None, None], a, 0.0)
    a = jnp.transpose(a, (0, 1, 3, 2, 4)).reshape(kh, w_in * ci, w_out * co)
    return a


def _pool_row_select(h_out, h_in):
    """0/1 matrices picking even / odd rows (left-multiply)."""
    r = jnp.arange(h_out)[:, None]
    c = jnp.arange(h_in)[None, :]
    se = (c == 2 * r).astype(jnp.float32)
    so = (c == 2 * r + 1).astype(jnp.float32)
    return se, so


def _pool_col_select(w_in, w_out, ch):
    """0/1 matrices picking even / odd width blocks in (W*C) lane layout."""
    rows = jnp.arange(w_in * ch)
    cols = jnp.arange(w_out * ch)
    rw, rc = rows // ch, rows % ch
    cw, cc = cols // ch, cols % ch
    same_c = rc[:, None] == cc[None, :]
    pe = ((rw[:, None] == 2 * cw[None, :]) & same_c).astype(jnp.float32)
    po = ((rw[:, None] == 2 * cw[None, :] + 1) & same_c).astype(jnp.float32)
    return pe, po


def _full_spec(shape):
    return pl.BlockSpec(shape, lambda b, _n=len(shape): (0,) * _n)


@jax.jit
def vdp_lenet_forward(x, params):
    """x: (B, 1, 28, 28) NCHW float32 -> (B, 10) softmax probabilities (mu)."""
    B = x.shape[0]

    # One-time glue: drop the singleton channel, zero-pad (conv1 padding=2).
    xp = jnp.pad(x.astype(jnp.float32)[:, 0, :, :], ((0, 0), (2, 2), (2, 2)))

    # Banded conv weights.
    a1 = _conv_band(params["conv1_w"], 32, 28)          # (5,  32, 168)
    a2 = _conv_band(params["conv2_w"], 14, 10)          # (5,  84, 160)
    a3 = _conv_band(params["conv3_w"], 5, 1)            # (5,  80, 120)

    # Bias rows tiled over the (W*C) lane layout.
    b1r = jnp.tile(params["conv1_b"].astype(jnp.float32), 28).reshape(1, 168)
    b2r = jnp.tile(params["conv2_b"].astype(jnp.float32), 10).reshape(1, 160)
    b3r = params["conv3_b"].astype(jnp.float32).reshape(1, 120)
    f1w = params["fc1_w"].T.astype(jnp.float32)                      # (120, 84)
    f1b = params["fc1_b"].astype(jnp.float32).reshape(1, 84)
    f2w = params["fc2_w"].T.astype(jnp.float32)                      # (84, 10)
    f2b = params["fc2_b"].astype(jnp.float32).reshape(1, 10)

    # Pooling selectors.
    se28, so28 = _pool_row_select(14, 28)
    p1e, p1o = _pool_col_select(28, 14, 6)               # (168, 84)
    se10, so10 = _pool_row_select(5, 10)
    p2e, p2o = _pool_col_select(10, 5, 16)               # (160, 80)

    weights = (a1, b1r, se28, so28, p1e, p1o,
               a2, b2r, se10, so10, p2e, p2o,
               a3, b3r, f1w, f1b, f2w, f2b)

    out = pl.pallas_call(
        _lenet_kernel,
        out_shape=jax.ShapeDtypeStruct((B, 1, 10), jnp.float32),
        grid=(B,),
        in_specs=[pl.BlockSpec((1, 32, 32), lambda b: (b, 0, 0))]
                 + [_full_spec(w.shape) for w in weights],
        out_specs=pl.BlockSpec((1, 1, 10), lambda b: (b, 0, 0)),
        compiler_params=pltpu.CompilerParams(dimension_semantics=("parallel",)),
    )(xp, *weights)
    return out.reshape(B, 10)


# ----------------------------------------------------------------------------
# Pure-JAX reference (for correctness check only)
# ----------------------------------------------------------------------------
def _reference_forward(x, params):
    def conv(h, w, b, pad):
        y = lax.conv_general_dilated(
            h, w, window_strides=(1, 1),
            padding=[(pad, pad), (pad, pad)],
            dimension_numbers=("NCHW", "OIHW", "NCHW"),
            precision=lax.Precision.HIGHEST)
        return y + b[None, :, None, None]

    def pool(h):
        return lax.reduce_window(h, -jnp.inf, lax.max,
                                 (1, 1, 2, 2), (1, 1, 2, 2), "VALID")

    h = pool(jnp.maximum(conv(x, params["conv1_w"], params["conv1_b"], 2), 0.0))
    h = pool(jnp.maximum(conv(h, params["conv2_w"], params["conv2_b"], 0), 0.0))
    h = jnp.maximum(conv(h, params["conv3_w"], params["conv3_b"], 0), 0.0)
    h = h.reshape(x.shape[0], -1)
    h = jnp.maximum(h @ params["fc1_w"].T + params["fc1_b"], 0.0)
    logits = h @ params["fc2_w"].T + params["fc2_b"]
    return jax.nn.softmax(logits, axis=-1)


def init_params(key):
    """Deterministic PyTorch-default-style uniform init for all mu weights."""
    ks = jax.random.split(key, 10)

    def conv_init(kw_, kb_, cout, cin, k):
        bound = 1.0 / jnp.sqrt(cin * k * k)
        w = jax.random.uniform(kw_, (cout, cin, k, k), jnp.float32, -bound, bound)
        b = jax.random.uniform(kb_, (cout,), jnp.float32, -bound, bound)
        return w, b

    def lin_init(kw_, kb_, out, inp):
        bound = 1.0 / jnp.sqrt(inp)
        w = jax.random.uniform(kw_, (out, inp), jnp.float32, -bound, bound)
        b = jax.random.uniform(kb_, (out,), jnp.float32, -bound, bound)
        return w, b

    c1w, c1b = conv_init(ks[0], ks[1], 6, 1, 5)
    c2w, c2b = conv_init(ks[2], ks[3], 16, 6, 5)
    c3w, c3b = conv_init(ks[4], ks[5], 120, 16, 5)
    f1w, f1b = lin_init(ks[6], ks[7], 84, 120)
    f2w, f2b = lin_init(ks[8], ks[9], 10, 84)
    return {
        "conv1_w": c1w, "conv1_b": c1b,
        "conv2_w": c2w, "conv2_b": c2b,
        "conv3_w": c3w, "conv3_b": c3b,
        "fc1_w": f1w, "fc1_b": f1b,
        "fc2_w": f2w, "fc2_b": f2b,
    }


if __name__ == "__main__":
    key = jax.random.PRNGKey(0)
    k_x, k_p = jax.random.split(key)
    # LeNet-5 geometry requires 28x28 inputs (pad2 conv -> 28 -> pool 14 ->
    # conv 10 -> pool 5 -> conv 1x1 -> 120 features for fc1).
    x = jax.random.normal(k_x, (2, 1, 28, 28), dtype=jnp.float32)
    params = init_params(k_p)

    out = jax.block_until_ready(vdp_lenet_forward(x, params))

    assert out.shape == (2, 10), out.shape
    assert jnp.allclose(jnp.sum(out, axis=-1), 1.0, atol=1e-5)
    ref = _reference_forward(x, params)
    assert jnp.allclose(out, ref, atol=5e-3), (out, ref)
    print("KERNEL_OK")
</pallas_src>

<mosaic_0001>
module attributes {stable_mosaic.version = 11 : i64} {
  func.func @_lenet_kernel(%arg0: i32, %arg1: memref<1x32x32xf32, #tpu.memory_space<vmem>>, %arg2: memref<5x32x168xf32, #tpu.memory_space<vmem>>, %arg3: memref<1x168xf32, #tpu.memory_space<vmem>>, %arg4: memref<14x28xf32, #tpu.memory_space<vmem>>, %arg5: memref<14x28xf32, #tpu.memory_space<vmem>>, %arg6: memref<168x84xf32, #tpu.memory_space<vmem>>, %arg7: memref<168x84xf32, #tpu.memory_space<vmem>>, %arg8: memref<5x84x160xf32, #tpu.memory_space<vmem>>, %arg9: memref<1x160xf32, #tpu.memory_space<vmem>>, %arg10: memref<5x10xf32, #tpu.memory_space<vmem>>, %arg11: memref<5x10xf32, #tpu.memory_space<vmem>>, %arg12: memref<160x80xf32, #tpu.memory_space<vmem>>, %arg13: memref<160x80xf32, #tpu.memory_space<vmem>>, %arg14: memref<5x80x120xf32, #tpu.memory_space<vmem>>, %arg15: memref<1x120xf32, #tpu.memory_space<vmem>>, %arg16: memref<120x84xf32, #tpu.memory_space<vmem>>, %arg17: memref<1x84xf32, #tpu.memory_space<vmem>>, %arg18: memref<84x10xf32, #tpu.memory_space<vmem>>, %arg19: memref<1x10xf32, #tpu.memory_space<vmem>>, %arg20: memref<1x1x10xf32, #tpu.memory_space<vmem>>) attributes {dimension_semantics = [#tpu.dimension_semantics<parallel>], iteration_bounds = array<i64: 2>, scalar_prefetch = 0 : i64, scratch_operands = 0 : i64, tpu.core_type = #tpu.core_type<tc>, window_params = [{transform_indices = @transform_0, window_bounds = array<i64: 1, 32, 32>}, {pipeline_mode = #tpu.pipeline_mode<synchronous>, transform_indices = @transform_1, window_bounds = array<i64: 5, 32, 168>}, {pipeline_mode = #tpu.pipeline_mode<synchronous>, transform_indices = @transform_2, window_bounds = array<i64: 1, 168>}, {pipeline_mode = #tpu.pipeline_mode<synchronous>, transform_indices = @transform_3, window_bounds = array<i64: 14, 28>}, {pipeline_mode = #tpu.pipeline_mode<synchronous>, transform_indices = @transform_4, window_bounds = array<i64: 14, 28>}, {pipeline_mode = #tpu.pipeline_mode<synchronous>, transform_indices = @transform_5, window_bounds = array<i64: 168, 84>}, {pipeline_mode = #tpu.pipeline_mode<synchronous>, transform_indices = @transform_6, window_bounds = array<i64: 168, 84>}, {pipeline_mode = #tpu.pipeline_mode<synchronous>, transform_indices = @transform_7, window_bounds = array<i64: 5, 84, 160>}, {pipeline_mode = #tpu.pipeline_mode<synchronous>, transform_indices = @transform_8, window_bounds = array<i64: 1, 160>}, {pipeline_mode = #tpu.pipeline_mode<synchronous>, transform_indices = @transform_9, window_bounds = array<i64: 5, 10>}, {pipeline_mode = #tpu.pipeline_mode<synchronous>, transform_indices = @transform_10, window_bounds = array<i64: 5, 10>}, {pipeline_mode = #tpu.pipeline_mode<synchronous>, transform_indices = @transform_11, window_bounds = array<i64: 160, 80>}, {pipeline_mode = #tpu.pipeline_mode<synchronous>, transform_indices = @transform_12, window_bounds = array<i64: 160, 80>}, {pipeline_mode = #tpu.pipeline_mode<synchronous>, transform_indices = @transform_13, window_bounds = array<i64: 5, 80, 120>}, {pipeline_mode = #tpu.pipeline_mode<synchronous>, transform_indices = @transform_14, window_bounds = array<i64: 1, 120>}, {pipeline_mode = #tpu.pipeline_mode<synchronous>, transform_indices = @transform_15, window_bounds = array<i64: 120, 84>}, {pipeline_mode = #tpu.pipeline_mode<synchronous>, transform_indices = @transform_16, window_bounds = array<i64: 1, 84>}, {pipeline_mode = #tpu.pipeline_mode<synchronous>, transform_indices = @transform_17, window_bounds = array<i64: 84, 10>}, {pipeline_mode = #tpu.pipeline_mode<synchronous>, transform_indices = @transform_18, window_bounds = array<i64: 1, 10>}, {transform_indices = @transform_19, window_bounds = array<i64: 1, 1, 10>}]} {
    %c0 = arith.constant 0 : index
    %c0_0 = arith.constant 0 : index
    %c0_1 = arith.constant 0 : index
    %0 = vector.load %arg1[%c0, %c0_0, %c0_1] : memref<1x32x32xf32, #tpu.memory_space<vmem>>, vector<1x32x32xf32>
    %1 = vector.shape_cast %0 : vector<1x32x32xf32> to vector<32x32xf32>
    %2 = vector.extract_strided_slice %1 {offsets = [0, 0], sizes = [28, 32], strides = [1, 1]} : vector<32x32xf32> to vector<28x32xf32>
    %c0_2 = arith.constant 0 : index
    %c0_3 = arith.constant 0 : index
    %c0_4 = arith.constant 0 : index
    %3 = vector.load %arg2[%c0_2, %c0_3, %c0_4] : memref<5x32x168xf32, #tpu.memory_space<vmem>>, vector<1x32x168xf32>
    %4 = vector.shape_cast %3 : vector<1x32x168xf32> to vector<32x168xf32>
    %cst = arith.constant dense<0.000000e+00> : vector<28x168xf32>
    %5 = tpu.matmul %2, %4, %cst {dimension_numbers = #tpu.dot_dimension_numbers<[1], [0], [0], [1], [0, 0, 1, 1], [], []>} : vector<28x32xf32>, vector<32x168xf32>, vector<28x168xf32> -> vector<28x168xf32>
    %6 = vector.extract_strided_slice %1 {offsets = [1, 0], sizes = [28, 32], strides = [1, 1]} : vector<32x32xf32> to vector<28x32xf32>
    %c1 = arith.constant 1 : index
    %c0_5 = arith.constant 0 : index
    %c0_6 = arith.constant 0 : index
    %7 = vector.load %arg2[%c1, %c0_5, %c0_6] : memref<5x32x168xf32, #tpu.memory_space<vmem>>, vector<1x32x168xf32>
    %8 = vector.shape_cast %7 : vector<1x32x168xf32> to vector<32x168xf32>
    %cst_7 = arith.constant dense<0.000000e+00> : vector<28x168xf32>
    %9 = tpu.matmul %6, %8, %cst_7 {dimension_numbers = #tpu.dot_dimension_numbers<[1], [0], [0], [1], [0, 0, 1, 1], [], []>} : vector<28x32xf32>, vector<32x168xf32>, vector<28x168xf32> -> vector<28x168xf32>
    %10 = arith.addf %5, %9 : vector<28x168xf32>
    %11 = vector.extract_strided_slice %1 {offsets = [2, 0], sizes = [28, 32], strides = [1, 1]} : vector<32x32xf32> to vector<28x32xf32>
    %c2 = arith.constant 2 : index
    %c0_8 = arith.constant 0 : index
    %c0_9 = arith.constant 0 : index
    %12 = vector.load %arg2[%c2, %c0_8, %c0_9] : memref<5x32x168xf32, #tpu.memory_space<vmem>>, vector<1x32x168xf32>
    %13 = vector.shape_cast %12 : vector<1x32x168xf32> to vector<32x168xf32>
    %cst_10 = arith.constant dense<0.000000e+00> : vector<28x168xf32>
    %14 = tpu.matmul %11, %13, %cst_10 {dimension_numbers = #tpu.dot_dimension_numbers<[1], [0], [0], [1], [0, 0, 1, 1], [], []>} : vector<28x32xf32>, vector<32x168xf32>, vector<28x168xf32> -> vector<28x168xf32>
    %15 = arith.addf %10, %14 : vector<28x168xf32>
    %16 = vector.extract_strided_slice %1 {offsets = [3, 0], sizes = [28, 32], strides = [1, 1]} : vector<32x32xf32> to vector<28x32xf32>
    %c3 = arith.constant 3 : index
    %c0_11 = arith.constant 0 : index
    %c0_12 = arith.constant 0 : index
    %17 = vector.load %arg2[%c3, %c0_11, %c0_12] : memref<5x32x168xf32, #tpu.memory_space<vmem>>, vector<1x32x168xf32>
    %18 = vector.shape_cast %17 : vector<1x32x168xf32> to vector<32x168xf32>
    %cst_13 = arith.constant dense<0.000000e+00> : vector<28x168xf32>
    %19 = tpu.matmul %16, %18, %cst_13 {dimension_numbers = #tpu.dot_dimension_numbers<[1], [0], [0], [1], [0, 0, 1, 1], [], []>} : vector<28x32xf32>, vector<32x168xf32>, vector<28x168xf32> -> vector<28x168xf32>
    %20 = arith.addf %15, %19 : vector<28x168xf32>
    %21 = vector.extract_strided_slice %1 {offsets = [4, 0], sizes = [28, 32], strides = [1, 1]} : vector<32x32xf32> to vector<28x32xf32>
    %c4 = arith.constant 4 : index
    %c0_14 = arith.constant 0 : index
    %c0_15 = arith.constant 0 : index
    %22 = vector.load %arg2[%c4, %c0_14, %c0_15] : memref<5x32x168xf32, #tpu.memory_space<vmem>>, vector<1x32x168xf32>
    %23 = vector.shape_cast %22 : vector<1x32x168xf32> to vector<32x168xf32>
    %cst_16 = arith.constant dense<0.000000e+00> : vector<28x168xf32>
    %24 = tpu.matmul %21, %23, %cst_16 {dimension_numbers = #tpu.dot_dimension_numbers<[1], [0], [0], [1], [0, 0, 1, 1], [], []>} : vector<28x32xf32>, vector<32x168xf32>, vector<28x168xf32> -> vector<28x168xf32>
    %25 = arith.addf %20, %24 : vector<28x168xf32>
    %c0_17 = arith.constant 0 : index
    %c0_18 = arith.constant 0 : index
    %26 = vector.load %arg3[%c0_17, %c0_18] : memref<1x168xf32, #tpu.memory_space<vmem>>, vector<1x168xf32>
    %27 = vector.broadcast %26 : vector<1x168xf32> to vector<28x168xf32>
    %28 = arith.addf %25, %27 : vector<28x168xf32>
    %cst_19 = arith.constant 0.000000e+00 : f32
    %29 = vector.broadcast %cst_19 : f32 to vector<28x168xf32>
    %30 = arith.maximumf %28, %29 : vector<28x168xf32>
    %c0_20 = arith.constant 0 : index
    %c0_21 = arith.constant 0 : index
    %31 = vector.load %arg4[%c0_20, %c0_21] : memref<14x28xf32, #tpu.memory_space<vmem>>, vector<14x28xf32>
    %cst_22 = arith.constant dense<0.000000e+00> : vector<14x168xf32>
    %32 = tpu.matmul %31, %30, %cst_22 {dimension_numbers = #tpu.dot_dimension_numbers<[1], [0], [0], [1], [0, 0, 1, 1], [], []>} : vector<14x28xf32>, vector<28x168xf32>, vector<14x168xf32> -> vector<14x168xf32>
    %c0_23 = arith.constant 0 : index
    %c0_24 = arith.constant 0 : index
    %33 = vector.load %arg5[%c0_23, %c0_24] : memref<14x28xf32, #tpu.memory_space<vmem>>, vector<14x28xf32>
    %cst_25 = arith.constant dense<0.000000e+00> : vector<14x168xf32>
    %34 = tpu.matmul %33, %30, %cst_25 {dimension_numbers = #tpu.dot_dimension_numbers<[1], [0], [0], [1], [0, 0, 1, 1], [], []>} : vector<14x28xf32>, vector<28x168xf32>, vector<14x168xf32> -> vector<14x168xf32>
    %35 = arith.maximumf %32, %34 : vector<14x168xf32>
    %c0_26 = arith.constant 0 : index
    %c0_27 = arith.constant 0 : index
    %36 = vector.load %arg6[%c0_26, %c0_27] : memref<168x84xf32, #tpu.memory_space<vmem>>, vector<168x84xf32>
    %cst_28 = arith.constant dense<0.000000e+00> : vector<14x84xf32>
    %37 = tpu.matmul %35, %36, %cst_28 {dimension_numbers = #tpu.dot_dimension_numbers<[1], [0], [0], [1], [0, 0, 1, 1], [], []>} : vector<14x168xf32>, vector<168x84xf32>, vector<14x84xf32> -> vector<14x84xf32>
    %c0_29 = arith.constant 0 : index
    %c0_30 = arith.constant 0 : index
    %38 = vector.load %arg7[%c0_29, %c0_30] : memref<168x84xf32, #tpu.memory_space<vmem>>, vector<168x84xf32>
    %cst_31 = arith.constant dense<0.000000e+00> : vector<14x84xf32>
    %39 = tpu.matmul %35, %38, %cst_31 {dimension_numbers = #tpu.dot_dimension_numbers<[1], [0], [0], [1], [0, 0, 1, 1], [], []>} : vector<14x168xf32>, vector<168x84xf32>, vector<14x84xf32> -> vector<14x84xf32>
    %40 = arith.maximumf %37, %39 : vector<14x84xf32>
    %41 = vector.extract_strided_slice %40 {offsets = [0, 0], sizes = [10, 84], strides = [1, 1]} : vector<14x84xf32> to vector<10x84xf32>
    %c0_32 = arith.constant 0 : index
    %c0_33 = arith.constant 0 : index
    %c0_34 = arith.constant 0 : index
    %42 = vector.load %arg8[%c0_32, %c0_33, %c0_34] : memref<5x84x160xf32, #tpu.memory_space<vmem>>, vector<1x84x160xf32>
    %43 = vector.shape_cast %42 : vector<1x84x160xf32> to vector<84x160xf32>
    %cst_35 = arith.constant dense<0.000000e+00> : vector<10x160xf32>
    %44 = tpu.matmul %41, %43, %cst_35 {dimension_numbers = #tpu.dot_dimension_numbers<[1], [0], [0], [1], [0, 0, 1, 1], [], []>} : vector<10x84xf32>, vector<84x160xf32>, vector<10x160xf32> -> vector<10x160xf32>
    %45 = vector.extract_strided_slice %40 {offsets = [1, 0], sizes = [10, 84], strides = [1, 1]} : vector<14x84xf32> to vector<10x84xf32>
    %c1_36 = arith.constant 1 : index
    %c0_37 = arith.constant 0 : index
    %c0_38 = arith.constant 0 : index
    %46 = vector.load %arg8[%c1_36, %c0_37, %c0_38] : memref<5x84x160xf32, #tpu.memory_space<vmem>>, vector<1x84x160xf32>
    %47 = vector.shape_cast %46 : vector<1x84x160xf32> to vector<84x160xf32>
    %cst_39 = arith.constant dense<0.000000e+00> : vector<10x160xf32>
    %48 = tpu.matmul %45, %47, %cst_39 {dimension_numbers = #tpu.dot_dimension_numbers<[1], [0], [0], [1], [0, 0, 1, 1], [], []>} : vector<10x84xf32>, vector<84x160xf32>, vector<10x160xf32> -> vector<10x160xf32>
    %49 = arith.addf %44, %48 : vector<10x160xf32>
    %50 = vector.extract_strided_slice %40 {offsets = [2, 0], sizes = [10, 84], strides = [1, 1]} : vector<14x84xf32> to vector<10x84xf32>
    %c2_40 = arith.constant 2 : index
    %c0_41 = arith.constant 0 : index
    %c0_42 = arith.constant 0 : index
    %51 = vector.load %arg8[%c2_40, %c0_41, %c0_42] : memref<5x84x160xf32, #tpu.memory_space<vmem>>, vector<1x84x160xf32>
    %52 = vector.shape_cast %51 : vector<1x84x160xf32> to vector<84x160xf32>
    %cst_43 = arith.constant dense<0.000000e+00> : vector<10x160xf32>
    %53 = tpu.matmul %50, %52, %cst_43 {dimension_numbers = #tpu.dot_dimension_numbers<[1], [0], [0], [1], [0, 0, 1, 1], [], []>} : vector<10x84xf32>, vector<84x160xf32>, vector<10x160xf32> -> vector<10x160xf32>
    %54 = arith.addf %49, %53 : vector<10x160xf32>
    %55 = vector.extract_strided_slice %40 {offsets = [3, 0], sizes = [10, 84], strides = [1, 1]} : vector<14x84xf32> to vector<10x84xf32>
    %c3_44 = arith.constant 3 : index
    %c0_45 = arith.constant 0 : index
    %c0_46 = arith.constant 0 : index
    %56 = vector.load %arg8[%c3_44, %c0_45, %c0_46] : memref<5x84x160xf32, #tpu.memory_space<vmem>>, vector<1x84x160xf32>
    %57 = vector.shape_cast %56 : vector<1x84x160xf32> to vector<84x160xf32>
    %cst_47 = arith.constant dense<0.000000e+00> : vector<10x160xf32>
    %58 = tpu.matmul %55, %57, %cst_47 {dimension_numbers = #tpu.dot_dimension_numbers<[1], [0], [0], [1], [0, 0, 1, 1], [], []>} : vector<10x84xf32>, vector<84x160xf32>, vector<10x160xf32> -> vector<10x160xf32>
    %59 = arith.addf %54, %58 : vector<10x160xf32>
    %60 = vector.extract_strided_slice %40 {offsets = [4, 0], sizes = [10, 84], strides = [1, 1]} : vector<14x84xf32> to vector<10x84xf32>
    %c4_48 = arith.constant 4 : index
    %c0_49 = arith.constant 0 : index
    %c0_50 = arith.constant 0 : index
    %61 = vector.load %arg8[%c4_48, %c0_49, %c0_50] : memref<5x84x160xf32, #tpu.memory_space<vmem>>, vector<1x84x160xf32>
    %62 = vector.shape_cast %61 : vector<1x84x160xf32> to vector<84x160xf32>
    %cst_51 = arith.constant dense<0.000000e+00> : vector<10x160xf32>
    %63 = tpu.matmul %60, %62, %cst_51 {dimension_numbers = #tpu.dot_dimension_numbers<[1], [0], [0], [1], [0, 0, 1, 1], [], []>} : vector<10x84xf32>, vector<84x160xf32>, vector<10x160xf32> -> vector<10x160xf32>
    %64 = arith.addf %59, %63 : vector<10x160xf32>
    %c0_52 = arith.constant 0 : index
    %c0_53 = arith.constant 0 : index
    %65 = vector.load %arg9[%c0_52, %c0_53] : memref<1x160xf32, #tpu.memory_space<vmem>>, vector<1x160xf32>
    %66 = vector.broadcast %65 : vector<1x160xf32> to vector<10x160xf32>
    %67 = arith.addf %64, %66 : vector<10x160xf32>
    %cst_54 = arith.constant 0.000000e+00 : f32
    %68 = vector.broadcast %cst_54 : f32 to vector<10x160xf32>
    %69 = arith.maximumf %67, %68 : vector<10x160xf32>
    %c0_55 = arith.constant 0 : index
    %c0_56 = arith.constant 0 : index
    %70 = vector.load %arg10[%c0_55, %c0_56] : memref<5x10xf32, #tpu.memory_space<vmem>>, vector<5x10xf32>
    %cst_57 = arith.constant dense<0.000000e+00> : vector<5x160xf32>
    %71 = tpu.matmul %70, %69, %cst_57 {dimension_numbers = #tpu.dot_dimension_numbers<[1], [0], [0], [1], [0, 0, 1, 1], [], []>} : vector<5x10xf32>, vector<10x160xf32>, vector<5x160xf32> -> vector<5x160xf32>
    %c0_58 = arith.constant 0 : index
    %c0_59 = arith.constant 0 : index
    %72 = vector.load %arg11[%c0_58, %c0_59] : memref<5x10xf32, #tpu.memory_space<vmem>>, vector<5x10xf32>
    %cst_60 = arith.constant dense<0.000000e+00> : vector<5x160xf32>
    %73 = tpu.matmul %72, %69, %cst_60 {dimension_numbers = #tpu.dot_dimension_numbers<[1], [0], [0], [1], [0, 0, 1, 1], [], []>} : vector<5x10xf32>, vector<10x160xf32>, vector<5x160xf32> -> vector<5x160xf32>
    %74 = arith.maximumf %71, %73 : vector<5x160xf32>
    %c0_61 = arith.constant 0 : index
    %c0_62 = arith.constant 0 : index
    %75 = vector.load %arg12[%c0_61, %c0_62] : memref<160x80xf32, #tpu.memory_space<vmem>>, vector<160x80xf32>
    %cst_63 = arith.constant dense<0.000000e+00> : vector<5x80xf32>
    %76 = tpu.matmul %74, %75, %cst_63 {dimension_numbers = #tpu.dot_dimension_numbers<[1], [0], [0], [1], [0, 0, 1, 1], [], []>} : vector<5x160xf32>, vector<160x80xf32>, vector<5x80xf32> -> vector<5x80xf32>
    %c0_64 = arith.constant 0 : index
    %c0_65 = arith.constant 0 : index
    %77 = vector.load %arg13[%c0_64, %c0_65] : memref<160x80xf32, #tpu.memory_space<vmem>>, vector<160x80xf32>
    %cst_66 = arith.constant dense<0.000000e+00> : vector<5x80xf32>
    %78 = tpu.matmul %74, %77, %cst_66 {dimension_numbers = #tpu.dot_dimension_numbers<[1], [0], [0], [1], [0, 0, 1, 1], [], []>} : vector<5x160xf32>, vector<160x80xf32>, vector<5x80xf32> -> vector<5x80xf32>
    %79 = arith.maximumf %76, %78 : vector<5x80xf32>
    %80 = vector.extract_strided_slice %79 {offsets = [0, 0], sizes = [1, 80], strides = [1, 1]} : vector<5x80xf32> to vector<1x80xf32>
    %c0_67 = arith.constant 0 : index
    %c0_68 = arith.constant 0 : index
    %c0_69 = arith.constant 0 : index
    %81 = vector.load %arg14[%c0_67, %c0_68, %c0_69] : memref<5x80x120xf32, #tpu.memory_space<vmem>>, vector<1x80x120xf32>
    %82 = vector.shape_cast %81 : vector<1x80x120xf32> to vector<80x120xf32>
    %cst_70 = arith.constant dense<0.000000e+00> : vector<1x120xf32>
    %83 = tpu.matmul %80, %82, %cst_70 {dimension_numbers = #tpu.dot_dimension_numbers<[1], [0], [0], [1], [0, 0, 1, 1], [], []>} : vector<1x80xf32>, vector<80x120xf32>, vector<1x120xf32> -> vector<1x120xf32>
    %84 = vector.extract_strided_slice %79 {offsets = [1, 0], sizes = [1, 80], strides = [1, 1]} : vector<5x80xf32> to vector<1x80xf32>
    %c1_71 = arith.constant 1 : index
    %c0_72 = arith.constant 0 : index
    %c0_73 = arith.constant 0 : index
    %85 = vector.load %arg14[%c1_71, %c0_72, %c0_73] : memref<5x80x120xf32, #tpu.memory_space<vmem>>, vector<1x80x120xf32>
    %86 = vector.shape_cast %85 : vector<1x80x120xf32> to vector<80x120xf32>
    %cst_74 = arith.constant dense<0.000000e+00> : vector<1x120xf32>
    %87 = tpu.matmul %84, %86, %cst_74 {dimension_numbers = #tpu.dot_dimension_numbers<[1], [0], [0], [1], [0, 0, 1, 1], [], []>} : vector<1x80xf32>, vector<80x120xf32>, vector<1x120xf32> -> vector<1x120xf32>
    %88 = arith.addf %83, %87 : vector<1x120xf32>
    %89 = vector.extract_strided_slice %79 {offsets = [2, 0], sizes = [1, 80], strides = [1, 1]} : vector<5x80xf32> to vector<1x80xf32>
    %c2_75 = arith.constant 2 : index
    %c0_76 = arith.constant 0 : index
    %c0_77 = arith.constant 0 : index
    %90 = vector.load %arg14[%c2_75, %c0_76, %c0_77] : memref<5x80x120xf32, #tpu.memory_space<vmem>>, vector<1x80x120xf32>
    %91 = vector.shape_cast %90 : vector<1x80x120xf32> to vector<80x120xf32>
    %cst_78 = arith.constant dense<0.000000e+00> : vector<1x120xf32>
    %92 = tpu.matmul %89, %91, %cst_78 {dimension_numbers = #tpu.dot_dimension_numbers<[1], [0], [0], [1], [0, 0, 1, 1], [], []>} : vector<1x80xf32>, vector<80x120xf32>, vector<1x120xf32> -> vector<1x120xf32>
    %93 = arith.addf %88, %92 : vector<1x120xf32>
    %94 = vector.extract_strided_slice %79 {offsets = [3, 0], sizes = [1, 80], strides = [1, 1]} : vector<5x80xf32> to vector<1x80xf32>
    %c3_79 = arith.constant 3 : index
    %c0_80 = arith.constant 0 : index
    %c0_81 = arith.constant 0 : index
    %95 = vector.load %arg14[%c3_79, %c0_80, %c0_81] : memref<5x80x120xf32, #tpu.memory_space<vmem>>, vector<1x80x120xf32>
    %96 = vector.shape_cast %95 : vector<1x80x120xf32> to vector<80x120xf32>
    %cst_82 = arith.constant dense<0.000000e+00> : vector<1x120xf32>
    %97 = tpu.matmul %94, %96, %cst_82 {dimension_numbers = #tpu.dot_dimension_numbers<[1], [0], [0], [1], [0, 0, 1, 1], [], []>} : vector<1x80xf32>, vector<80x120xf32>, vector<1x120xf32> -> vector<1x120xf32>
    %98 = arith.addf %93, %97 : vector<1x120xf32>
    %99 = vector.extract_strided_slice %79 {offsets = [4, 0], sizes = [1, 80], strides = [1, 1]} : vector<5x80xf32> to vector<1x80xf32>
    %c4_83 = arith.constant 4 : index
    %c0_84 = arith.constant 0 : index
    %c0_85 = arith.constant 0 : index
    %100 = vector.load %arg14[%c4_83, %c0_84, %c0_85] : memref<5x80x120xf32, #tpu.memory_space<vmem>>, vector<1x80x120xf32>
    %101 = vector.shape_cast %100 : vector<1x80x120xf32> to vector<80x120xf32>
    %cst_86 = arith.constant dense<0.000000e+00> : vector<1x120xf32>
    %102 = tpu.matmul %99, %101, %cst_86 {dimension_numbers = #tpu.dot_dimension_numbers<[1], [0], [0], [1], [0, 0, 1, 1], [], []>} : vector<1x80xf32>, vector<80x120xf32>, vector<1x120xf32> -> vector<1x120xf32>
    %103 = arith.addf %98, %102 : vector<1x120xf32>
    %c0_87 = arith.constant 0 : index
    %c0_88 = arith.constant 0 : index
    %104 = vector.load %arg15[%c0_87, %c0_88] : memref<1x120xf32, #tpu.memory_space<vmem>>, vector<1x120xf32>
    %105 = arith.addf %103, %104 : vector<1x120xf32>
    %cst_89 = arith.constant 0.000000e+00 : f32
    %106 = vector.broadcast %cst_89 : f32 to vector<1x120xf32>
    %107 = arith.maximumf %105, %106 : vector<1x120xf32>
    %c0_90 = arith.constant 0 : index
    %c0_91 = arith.constant 0 : index
    %108 = vector.load %arg16[%c0_90, %c0_91] : memref<120x84xf32, #tpu.memory_space<vmem>>, vector<120x84xf32>
    %cst_92 = arith.constant dense<0.000000e+00> : vector<1x84xf32>
    %109 = tpu.matmul %107, %108, %cst_92 {dimension_numbers = #tpu.dot_dimension_numbers<[1], [0], [0], [1], [0, 0, 1, 1], [], []>} : vector<1x120xf32>, vector<120x84xf32>, vector<1x84xf32> -> vector<1x84xf32>
    %c0_93 = arith.constant 0 : index
    %c0_94 = arith.constant 0 : index
    %110 = vector.load %arg17[%c0_93, %c0_94] : memref<1x84xf32, #tpu.memory_space<vmem>>, vector<1x84xf32>
    %111 = arith.addf %109, %110 : vector<1x84xf32>
    %cst_95 = arith.constant 0.000000e+00 : f32
    %112 = vector.broadcast %cst_95 : f32 to vector<1x84xf32>
    %113 = arith.maximumf %111, %112 : vector<1x84xf32>
    %c0_96 = arith.constant 0 : index
    %c0_97 = arith.constant 0 : index
    %114 = vector.load %arg18[%c0_96, %c0_97] : memref<84x10xf32, #tpu.memory_space<vmem>>, vector<84x10xf32>
    %cst_98 = arith.constant dense<0.000000e+00> : vector<1x10xf32>
    %115 = tpu.matmul %113, %114, %cst_98 {dimension_numbers = #tpu.dot_dimension_numbers<[1], [0], [0], [1], [0, 0, 1, 1], [], []>} : vector<1x84xf32>, vector<84x10xf32>, vector<1x10xf32> -> vector<1x10xf32>
    %c0_99 = arith.constant 0 : index
    %c0_100 = arith.constant 0 : index
    %116 = vector.load %arg19[%c0_99, %c0_100] : memref<1x10xf32, #tpu.memory_space<vmem>>, vector<1x10xf32>
    %117 = arith.addf %115, %116 : vector<1x10xf32>
    %cst_101 = arith.constant dense<0xFF800000> : vector<1xf32>
    %118 = vector.multi_reduction <maximumf>, %117, %cst_101 [1] : vector<1x10xf32> to vector<1xf32>
    %119 = vector.shape_cast %118 : vector<1xf32> to vector<1x1xf32>
    %120 = vector.broadcast %119 : vector<1x1xf32> to vector<1x10xf32>
    %121 = arith.subf %117, %120 : vector<1x10xf32>
    %122 = math.exp %121 : vector<1x10xf32>
    %cst_102 = arith.constant dense<0.000000e+00> : vector<1xf32>
    %123 = vector.multi_reduction <add>, %122, %cst_102 [1] : vector<1x10xf32> to vector<1xf32>
    %124 = vector.shape_cast %123 : vector<1xf32> to vector<1x1xf32>
    %125 = vector.broadcast %124 : vector<1x1xf32> to vector<1x10xf32>
    %126 = arith.divf %122, %125 : vector<1x10xf32>
    %c0_103 = arith.constant 0 : index
    %c0_104 = arith.constant 0 : index
    %c0_105 = arith.constant 0 : index
    %127 = vector.load %arg20[%c0_103, %c0_104, %c0_105] : memref<1x1x10xf32, #tpu.memory_space<vmem>>, vector<1x1x10xf32>
    %128 = vector.shape_cast %127 : vector<1x1x10xf32> to vector<1x10xf32>
    %129 = vector.shape_cast %126 : vector<1x10xf32> to vector<1x1x10xf32>
    tpu.vector_store %arg20[%c0_103, %c0_104, %c0_105], %129 {strides = array<i32>} : memref<1x1x10xf32, #tpu.memory_space<vmem>>, vector<1x1x10xf32>,
    return
  }
  func.func @transform_0(%arg0: i32) -> (i32, i32, i32) {
    %c0_i32 = arith.constant 0 : i32
    %c0_i32_0 = arith.constant 0 : i32
    %c0_i32_1 = arith.constant 0 : i32
    return %arg0, %c0_i32, %c0_i32_0 : i32, i32, i32
  }
  func.func @transform_1(%arg0: i32) -> (i32, i32, i32) {
    %c0_i32 = arith.constant 0 : i32
    %c0_i32_0 = arith.constant 0 : i32
    %c0_i32_1 = arith.constant 0 : i32
    %c0_i32_2 = arith.constant 0 : i32
    return %c0_i32, %c0_i32_0, %c0_i32_1 : i32, i32, i32
  }
  func.func @transform_2(%arg0: i32) -> (i32, i32) {
    %c0_i32 = arith.constant 0 : i32
    %c0_i32_0 = arith.constant 0 : i32
    %c0_i32_1 = arith.constant 0 : i32
    return %c0_i32, %c0_i32_0 : i32, i32
  }
  func.func @transform_3(%arg0: i32) -> (i32, i32) {
    %c0_i32 = arith.constant 0 : i32
    %c0_i32_0 = arith.constant 0 : i32
    %c0_i32_1 = arith.constant 0 : i32
    return %c0_i32, %c0_i32_0 : i32, i32
  }
  func.func @transform_4(%arg0: i32) -> (i32, i32) {
    %c0_i32 = arith.constant 0 : i32
    %c0_i32_0 = arith.constant 0 : i32
    %c0_i32_1 = arith.constant 0 : i32
    return %c0_i32, %c0_i32_0 : i32, i32
  }
  func.func @transform_5(%arg0: i32) -> (i32, i32) {
    %c0_i32 = arith.constant 0 : i32
    %c0_i32_0 = arith.constant 0 : i32
    %c0_i32_1 = arith.constant 0 : i32
    return %c0_i32, %c0_i32_0 : i32, i32
  }
  func.func @transform_6(%arg0: i32) -> (i32, i32) {
    %c0_i32 = arith.constant 0 : i32
    %c0_i32_0 = arith.constant 0 : i32
    %c0_i32_1 = arith.constant 0 : i32
    return %c0_i32, %c0_i32_0 : i32, i32
  }
  func.func @transform_7(%arg0: i32) -> (i32, i32, i32) {
    %c0_i32 = arith.constant 0 : i32
    %c0_i32_0 = arith.constant 0 : i32
    %c0_i32_1 = arith.constant 0 : i32
    %c0_i32_2 = arith.constant 0 : i32
    return %c0_i32, %c0_i32_0, %c0_i32_1 : i32, i32, i32
  }
  func.func @transform_8(%arg0: i32) -> (i32, i32) {
    %c0_i32 = arith.constant 0 : i32
    %c0_i32_0 = arith.constant 0 : i32
    %c0_i32_1 = arith.constant 0 : i32
    return %c0_i32, %c0_i32_0 : i32, i32
  }
  func.func @transform_9(%arg0: i32) -> (i32, i32) {
    %c0_i32 = arith.constant 0 : i32
    %c0_i32_0 = arith.constant 0 : i32
    %c0_i32_1 = arith.constant 0 : i32
    return %c0_i32, %c0_i32_0 : i32, i32
  }
  func.func @transform_10(%arg0: i32) -> (i32, i32) {
    %c0_i32 = arith.constant 0 : i32
    %c0_i32_0 = arith.constant 0 : i32
    %c0_i32_1 = arith.constant 0 : i32
    return %c0_i32, %c0_i32_0 : i32, i32
  }
  func.func @transform_11(%arg0: i32) -> (i32, i32) {
    %c0_i32 = arith.constant 0 : i32
    %c0_i32_0 = arith.constant 0 : i32
    %c0_i32_1 = arith.constant 0 : i32
    return %c0_i32, %c0_i32_0 : i32, i32
  }
  func.func @transform_12(%arg0: i32) -> (i32, i32) {
    %c0_i32 = arith.constant 0 : i32
    %c0_i32_0 = arith.constant 0 : i32
    %c0_i32_1 = arith.constant 0 : i32
    return %c0_i32, %c0_i32_0 : i32, i32
  }
  func.func @transform_13(%arg0: i32) -> (i32, i32, i32) {
    %c0_i32 = arith.constant 0 : i32
    %c0_i32_0 = arith.constant 0 : i32
    %c0_i32_1 = arith.constant 0 : i32
    %c0_i32_2 = arith.constant 0 : i32
    return %c0_i32, %c0_i32_0, %c0_i32_1 : i32, i32, i32
  }
  func.func @transform_14(%arg0: i32) -> (i32, i32) {
    %c0_i32 = arith.constant 0 : i32
    %c0_i32_0 = arith.constant 0 : i32
    %c0_i32_1 = arith.constant 0 : i32
    return %c0_i32, %c0_i32_0 : i32, i32
  }
  func.func @transform_15(%arg0: i32) -> (i32, i32) {
    %c0_i32 = arith.constant 0 : i32
    %c0_i32_0 = arith.constant 0 : i32
    %c0_i32_1 = arith.constant 0 : i32
    return %c0_i32, %c0_i32_0 : i32, i32
  }
  func.func @transform_16(%arg0: i32) -> (i32, i32) {
    %c0_i32 = arith.constant 0 : i32
    %c0_i32_0 = arith.constant 0 : i32
    %c0_i32_1 = arith.constant 0 : i32
    return %c0_i32, %c0_i32_0 : i32, i32
  }
  func.func @transform_17(%arg0: i32) -> (i32, i32) {
    %c0_i32 = arith.constant 0 : i32
    %c0_i32_0 = arith.constant 0 : i32
    %c0_i32_1 = arith.constant 0 : i32
    return %c0_i32, %c0_i32_0 : i32, i32
  }
  func.func @transform_18(%arg0: i32) -> (i32, i32) {
    %c0_i32 = arith.constant 0 : i32
    %c0_i32_0 = arith.constant 0 : i32
    %c0_i32_1 = arith.constant 0 : i32
    return %c0_i32, %c0_i32_0 : i32, i32
  }
  func.func @transform_19(%arg0: i32) -> (i32, i32, i32) {
    %c0_i32 = arith.constant 0 : i32
    %c0_i32_0 = arith.constant 0 : i32
    %c0_i32_1 = arith.constant 0 : i32
    return %arg0, %c0_i32, %c0_i32_0 : i32, i32, i32
  }
}

</mosaic_0001>

<bundles_post_ra>
// kernel: tile.13
= control target key start
LH: loop header
LB: loop body
LE: loop exit
PB: predicated region body
PF: predicated region fallthrough
CT: control target
= control target key end

     0   :  { %s40_s0 = inlined_call_operand.vmem [shape: f32[6], index: 0, kind: input, shape index: {}]   ;;  %s41_s1 = inlined_call_operand.vmem [shape: f32[28,6], index: 1, kind: output, shape index: {}]  }
   0x1   :  { %v4_v0 = vld [vmem:[%s40_s0] ss:$0 sm:$0xff] }
   0x2   :  { %5 = vst [vmem:[%s41_s1] sm:$0xff] %v4_v0  ;;  %12 = vst [vmem:[%s41_s1 + $0x8] sm:$0xff] %v4_v0 }
   0x3   :  { %13 = vst [vmem:[%s41_s1 + $0x10] sm:$0xff] %v4_v0  ;;  %14 = vst [vmem:[%s41_s1 + $0x18] sm:$0xff] %v4_v0 }

// kernel: tile.14
= control target key start
LH: loop header
LB: loop body
LE: loop exit
PB: predicated region body
PF: predicated region fallthrough
CT: control target
= control target key end

     0   :  { %vm9_vm0 = vcmask 15360   ;;  %s247_s12 = smov 126   ;;  %s248_s13 = smov 114   ;;  %vm3_vm1 = vcmask 48128   ;;  %vm13_vm2 = vcmask 31744   ;;  %vm16_vm3 = vcmask 1048560   ;;  %s377_s0 = inlined_call_operand.vmem [shape: f32[28,6], index: 0, kind: input, shape index: {}]   ;;  %s378_s1 = inlined_call_operand.vmem [shape: f32[1,168], index: 1, kind: output, shape index: {}]  }
   0x1   :  { %v191_v0 = vld [vmem:[%s377_s0 + $0x15] sm:$0x1]   ;;  %v194_v3 = vld [vmem:[%s377_s0 + $0x13] sm:$0x1]   ;;  %v193_v4 = vld [vmem:[%s377_s0 + $0x14] sm:$0x1]  }
   0x2   :  { %v192_v1 = vld [vmem:[%s377_s0 + $0x15] sm:$0x1]   ;;  %26 = vrot.lane.b32.xlu1 %v194_v3, %s248_s13  ;;  %v195_v5 = vld [vmem:[%s377_s0 + $0x12] sm:$0x1]   ;;  %s249_s18 = smov 120   ;;  %s250_s19 = smov 108  }
   0x3   :  { %v10_v2 = vsel %vm9_vm0, %v192_v1, %v191_v0  ;;  %v196_v6 = vld [vmem:[%s377_s0 + $0x11] sm:$0x1]   ;;  %v197_v7 = vld [vmem:[%s377_s0 + $0x10] sm:$0x1]   ;;  %s251_s24 = smov 102   ;;  %s252_s25 = smov 96  }
   0x4   :  { %11 = vrot.lane.b32.xlu0 %v10_v2, %s247_s12  ;;  %v198_v8 = vld [vmem:[%s377_s0 + $0xf] sm:$0x1]   ;;  %v199_v9 = vld [vmem:[%s377_s0 + $0xe] sm:$0x1]   ;;  %s253_s30 = smov 90   ;;  %s254_s2 = smov 84  }
   0x5   :  { %v2_v10 = vld [vmem:[%s377_s0] sm:$0x1]   ;;  %v200_v11 = vld [vmem:[%s377_s0 + $0xd] sm:$0x1]   ;;  %v201_v12 = vld [vmem:[%s377_s0 + $0xc] sm:$0x1]  }
   0x6   :  { %32 = vrot.lane.b32.xlu1 %v195_v5, %s250_s19  ;;  %4 = vst.msk [vmem:[#allocation0] sm:$0x1] %vm3_vm1, %v2_v10   ;;  %s255_s9 = smov 78   ;;  %s256_s10 = smov 72   ;;  %v202_v13 = vld [vmem:[%s377_s0 + $0xb] sm:$0x1]  }
   0x7   :  { %v203_v14 = vld [vmem:[%s377_s0 + $0xa] sm:$0x1]   ;;  %s257_s15 = smov 66   ;;  %s258_s16 = smov 60   ;;  %v204_v15 = vld [vmem:[%s377_s0 + $0x9] sm:$0x1]  }
   0x8   :  { %20 = vrot.lane.b32.xlu0 %v193_v4, %s249_s18  ;;  %v205_v16 = vld [vmem:[%s377_s0 + $0x8] sm:$0x1]   ;;  %s259_s21 = smov 54   ;;  %s260_s22 = smov 48   ;;  %v206_v17 = vld [vmem:[%s377_s0 + $0x7] sm:$0x1]  }
   0x9   :  { %v207_v18 = vld [vmem:[%s377_s0 + $0x6] sm:$0x1]   ;;  %s261_s27 = smov 42   ;;  %s262_s28 = smov 36   ;;  %v208_v19 = vld [vmem:[%s377_s0 + $0x1b] sm:$0x1]  }
   0xa   :  { %44 = vrot.lane.b32.xlu1 %v197_v7, %s252_s25  ;;  %v209_v20 = vld [vmem:[%s377_s0 + $0x5] sm:$0x1]   ;;  %s263_s4 = smov 34   ;;  %s264_s5 = smov 30   ;;  %v210_v21 = vld [vmem:[%s377_s0 + $0x1a] sm:$0x1]  }
   0xb   :  { %v211_v22 = vld [vmem:[%s377_s0 + $0x4] sm:$0x1]   ;;  %s266_s11 = smov 24   ;;  %v212_v23 = vld [vmem:[%s377_s0 + $0x19] sm:$0x1]   ;;  %s268_s17 = smov 18  }
   0xc   :  { %38 = vrot.lane.b32.xlu0 %v196_v6, %s251_s24  ;;  %v213_v24 = vld [vmem:[%s377_s0 + $0x3] sm:$0x1]   ;;  %v214_v25 = vld [vmem:[%s377_s0 + $0x18] sm:$0x1]   ;;  %v215_v26 = vld [vmem:[%s377_s0 + $0x2] sm:$0x1]  }
   0xd   :  { %s270_s23 = smov 12   ;;  %v216_v27 = vld [vmem:[%s377_s0 + $0x17] sm:$0x1]   ;;  %v217_v28 = vld [vmem:[%s377_s0 + $0x1] sm:$0x1]   ;;  %s272_s29 = smov 6  }
   0xe   :  { %56 = vrot.lane.b32.xlu1 %v199_v9, %s254_s2  ;;  %v218_v29 = vld [vmem:[%s377_s0 + $0x16] sm:$0x1]   ;;  %s273_s0 = smov 4   ;;  %vm22_vm4 = vcmask 1032128   ;;  %vm28_vm5 = vcmask 982928   ;;  %vm34_vm6 = vcmask 933728  }
   0xf   :  { %vm40_vm7 = vcmask 884528   ;;  %vm46_vm8 = vcmask 835328   ;;  %vm52_vm9 = vcmask 786128   ;;  %vm58_vm10 = vcmask 736928  }
  0x10   :  { %50 = vrot.lane.b32.xlu0 %v198_v8, %s253_s30  ;;  %vm64_vm11 = vcmask 687728   ;;  %vm70_vm12 = vcmask 638528   ;;  %vm76_vm13 = vcmask 589328   ;;  %vm82_vm14 = vcmask 540128  }
  0x11   :  { %vm88_vm15 = vcmask 490928   ;;  %vm94_vm0 = vcmask 441728   ;;  %vm100_vm1 = vcmask 392528  }
  0x12   :  { %68 = vrot.lane.b32.xlu1 %v201_v12, %s256_s10  ;;  %s265_s10 = smov 28  }
  0x14   :  { %62 = vrot.lane.b32.xlu0 %v200_v11, %s255_s9 }
  0x16   :  { %80 = vrot.lane.b32.xlu1 %v203_v14, %s258_s16  ;;  %s267_s16 = smov 22  }
  0x18   :  { %74 = vrot.lane.b32.xlu0 %v202_v13, %s257_s15 }
  0x1a   :  { %92 = vrot.lane.b32.xlu1 %v205_v16, %s260_s22  ;;  %s269_s22 = smov 16  }
  0x1c   :  { %86 = vrot.lane.b32.xlu0 %v204_v15, %s259_s21 }
  0x1e   :  { %104 = vrot.lane.b32.xlu1 %v207_v18, %s262_s28  ;;  %s271_s28 = smov 10  }
  0x20   :  { %98 = vrot.lane.b32.xlu0 %v206_v17, %s261_s27 }
  0x22   :  { %117 = vrot.lane.b32.xlu1 %v209_v20, %s264_s5 }
  0x24   :  { %110 = vrot.lane.b32.xlu0 %v208_v19, %s263_s4 }
  0x26   :  { %130 = vrot.lane.b32.xlu1 %v211_v22, %s266_s11 }
  0x28   :  { %123 = vrot.lane.b32.xlu0 %v210_v21, %s265_s10 }
  0x2a   :  { %143 = vrot.lane.b32.xlu1 %v213_v24, %s268_s17 }
  0x2c   :  { %136 = vrot.lane.b32.xlu0 %v212_v23, %s267_s16 }
  0x2e   :  { %156 = vrot.lane.b32.xlu1 %v215_v26, %s270_s23 }
  0x30   :  { %149 = vrot.lane.b32.xlu0 %v214_v25, %s269_s22 }
  0x32   :  { %169 = vrot.lane.b32.xlu1 %v217_v28, %s272_s29 }
  0x34   :  { %162 = vrot.lane.b32.xlu0 %v216_v27, %s271_s28 }
  0x38   :  { %175 = vrot.lane.b32.xlu0 %v218_v29, %s273_s0 }
  0x74   :  { %v27_v31 = vpop.permute.xlu1 %26  }
  0x76   :  { %v12_v30 = vpop.permute.xlu0 %11  }
  0x77   :  { %15 = vst.msk [vmem:[#allocation0 + $0x8] sm:$0x1] %vm13_vm2, %v12_v30   ;;  %vm106_vm2 = vcmask 343328  }
  0x78   :  { %17 = vst.msk [vmem:[#allocation0] sm:$0x1] %vm16_vm3, %v12_v30   ;;  %v33_v33 = vpop.permute.xlu1 %32   ;;  %vm112_vm3 = vcmask 326928  }
  0x7a   :  { %v21_v32 = vpop.permute.xlu0 %20  }
  0x7b   :  { %23 = vst.msk [vmem:[#allocation0] sm:$0x1] %vm22_vm4, %v21_v32   ;;  %vm119_vm4 = vcmask 294128  }
  0x7c   :  { %29 = vst.msk [vmem:[#allocation0] sm:$0x1] %vm28_vm5, %v27_v31   ;;  %v45_v35 = vpop.permute.xlu1 %44   ;;  %vm125_vm5 = vcmask 277728  }
  0x7d   :  { %35 = vst.msk [vmem:[#allocation0] sm:$0x1] %vm34_vm6, %v33_v33   ;;  %vm132_vm6 = vcmask 244928  }
  0x7e   :  { %v39_v34 = vpop.permute.xlu0 %38  }
  0x7f   :  { %41 = vst.msk [vmem:[#allocation0] sm:$0x1] %vm40_vm7, %v39_v34   ;;  %vm138_vm7 = vcmask 228528  }
  0x80   :  { %47 = vst.msk [vmem:[#allocation0] sm:$0x1] %vm46_vm8, %v45_v35   ;;  %v57_v37 = vpop.permute.xlu1 %56   ;;  %vm145_vm8 = vcmask 195728  }
  0x82   :  { %v51_v36 = vpop.permute.xlu0 %50  }
  0x83   :  { %53 = vst.msk [vmem:[#allocation0] sm:$0x1] %vm52_vm9, %v51_v36   ;;  %vm151_vm9 = vcmask 179328  }
  0x84   :  { %59 = vst.msk [vmem:[#allocation0] sm:$0x1] %vm58_vm10, %v57_v37   ;;  %v69_v39 = vpop.permute.xlu1 %68   ;;  %vm158_vm10 = vcmask 146528  }
  0x86   :  { %v63_v38 = vpop.permute.xlu0 %62  }
  0x87   :  { %65 = vst.msk [vmem:[#allocation0] sm:$0x1] %vm64_vm11, %v63_v38   ;;  %vm164_vm11 = vcmask 130128  }
  0x88   :  { %71 = vst.msk [vmem:[#allocation0] sm:$0x1] %vm70_vm12, %v69_v39   ;;  %v81_v41 = vpop.permute.xlu1 %80   ;;  %vm171_vm12 = vcmask 97328  }
  0x8a   :  { %v75_v40 = vpop.permute.xlu0 %74  }
  0x8b   :  { %77 = vst.msk [vmem:[#allocation0] sm:$0x1] %vm76_vm13, %v75_v40   ;;  %vm177_vm13 = vcmask 80928  }
  0x8c   :  { %83 = vst.msk [vmem:[#allocation0] sm:$0x1] %vm82_vm14, %v81_v41   ;;  %v93_v43 = vpop.permute.xlu1 %92  }
  0x8e   :  { %v87_v42 = vpop.permute.xlu0 %86  }
  0x8f   :  { %89 = vst.msk [vmem:[#allocation0] sm:$0x1] %vm88_vm15, %v87_v42  }
  0x90   :  { %95 = vst.msk [vmem:[#allocation0] sm:$0x1] %vm94_vm0, %v93_v43   ;;  %v105_v45 = vpop.permute.xlu1 %104  }
  0x92   :  { %v99_v44 = vpop.permute.xlu0 %98  }
  0x93   :  { %101 = vst.msk [vmem:[#allocation0] sm:$0x1] %vm100_vm1, %v99_v44  }
  0x94   :  { %107 = vst.msk [vmem:[#allocation0] sm:$0x1] %vm106_vm2, %v105_v45   ;;  %v118_v47 = vpop.permute.xlu1 %117  }
  0x95   :  { %120 = vst.msk [vmem:[#allocation0] sm:$0x1] %vm119_vm4, %v118_v47  }
  0x96   :  { %v111_v46 = vpop.permute.xlu0 %110  }
  0x97   :  { %114 = vst.msk [vmem:[#allocation0 + $0x8] sm:$0x1] %vm112_vm3, %v111_v46  }
  0x98   :  { %v131_v49 = vpop.permute.xlu1 %130  }
  0x99   :  { %133 = vst.msk [vmem:[#allocation0] sm:$0x1] %vm132_vm6, %v131_v49  }
  0x9a   :  { %v124_v48 = vpop.permute.xlu0 %123  }
  0x9b   :  { %127 = vst.msk [vmem:[#allocation0 + $0x8] sm:$0x1] %vm125_vm5, %v124_v48  }
  0x9c   :  { %v144_v51 = vpop.permute.xlu1 %143  }
  0x9d   :  { %146 = vst.msk [vmem:[#allocation0] sm:$0x1] %vm145_vm8, %v144_v51  }
  0x9e   :  { %v137_v50 = vpop.permute.xlu0 %136  }
  0x9f   :  { %140 = vst.msk [vmem:[#allocation0 + $0x8] sm:$0x1] %vm138_vm7, %v137_v50  }
  0xa0   :  { %v157_v53 = vpop.permute.xlu1 %156  }
  0xa1   :  { %159 = vst.msk [vmem:[#allocation0] sm:$0x1] %vm158_vm10, %v157_v53  }
  0xa2   :  { %v150_v52 = vpop.permute.xlu0 %149  }
  0xa3   :  { %153 = vst.msk [vmem:[#allocation0 + $0x8] sm:$0x1] %vm151_vm9, %v150_v52  }
  0xa4   :  { %v170_v55 = vpop.permute.xlu1 %169  }
  0xa5   :  { %172 = vst.msk [vmem:[#allocation0] sm:$0x1] %vm171_vm12, %v170_v55  }
  0xa6   :  { %v163_v54 = vpop.permute.xlu0 %162  }
  0xa7   :  { %166 = vst.msk [vmem:[#allocation0 + $0x8] sm:$0x1] %vm164_vm11, %v163_v54  }
  0xaa   :  { %v176_v56 = vpop.permute.xlu0 %175  }
  0xab   :  { %179 = vst.msk [vmem:[#allocation0 + $0x8] sm:$0x1] %vm177_vm13, %v176_v56  }
  0xac   :  { %v183_v57 = vld [vmem:[#allocation0] sm:$0x1] }
  0xad   :  { %185 = vst [vmem:[%s378_s1] sm:$0x1] %v183_v57 }
  0xb2   :  { %v187_v58 = vld [vmem:[#allocation0 + $0x8] sm:$0x1] }
  0xb3   :  { %219 = vst [vmem:[%s378_s1 + $0x1] sm:$0x1] %v187_v58 }

// kernel: tile.18
= control target key start
LH: loop header
LB: loop body
LE: loop exit
PB: predicated region body
PF: predicated region fallthrough
CT: control target
= control target key end

     0   :  { %s28_s0 = inlined_call_operand.vmem [shape: f32[16], index: 0, kind: input, shape index: {}]   ;;  %s29_s1 = inlined_call_operand.vmem [shape: f32[10,16], index: 1, kind: output, shape index: {}]  }
   0x1   :  { %v4_v0 = vld [vmem:[%s28_s0] ss:$0 sm:$0xff] }
   0x2   :  { %5 = vst [vmem:[%s29_s1] sm:$0xff] %v4_v0  ;;  %8 = vst [vmem:[%s29_s1 + $0x8] sm:$0xff] %v4_v0 }

// kernel: tile.19
= control target key start
LH: loop header
LB: loop body
LE: loop exit
PB: predicated region body
PF: predicated region fallthrough
CT: control target
= control target key end

     0   :  { %s75_s10 = smov 112   ;;  %s76_s11 = smov 80   ;;  %vm4_vm0 = vcmask 130048   ;;  %vm10_vm1 = vcmask 1048448   ;;  %vm16_vm2 = vcmask 917248   ;;  %vm22_vm3 = vcmask 786048   ;;  %s122_s0 = inlined_call_operand.vmem [shape: f32[10,16], index: 0, kind: input, shape index: {}]   ;;  %s123_s1 = inlined_call_operand.vmem [shape: f32[1,160], index: 1, kind: output, shape index: {}]  }
   0x1   :  { %v60_v0 = vld [vmem:[%s122_s0 + $0x7] sm:$0x1]   ;;  %v62_v1 = vld [vmem:[%s122_s0 + $0x5] sm:$0x1]   ;;  %v61_v2 = vld [vmem:[%s122_s0 + $0x6] sm:$0x1]  }
   0x2   :  { %8 = vrot.lane.b32.xlu0 %v60_v0, %s75_s10  ;;  %20 = vrot.lane.b32.xlu1 %v62_v1, %s76_s11  ;;  %v63_v3 = vld [vmem:[%s122_s0 + $0x4] sm:$0x1]   ;;  %s2_s16 = smov 3  ;;  %s77_s17 = smov 96   ;;  %v64_v5 = vld [vmem:[%s122_s0 + $0x3] sm:$0x1]  }
   0x3   :  { %s78_s18 = smov 64   ;;  %v3_v4 = vld [vmem:[%s122_s0] ss:$8 sm:%s2_s16]   ;;  %v65_v6 = vld [vmem:[%s122_s0 + $0x2] sm:$0x1]   ;;  %s43_s25 = smov 3 }
   0x4   :  { %5 = vst.msk [vmem:[#allocation0] ss:$8 sm:$0x3] %vm4_vm0, %v3_v4   ;;  %s79_s26 = smov 48   ;;  %s80_s27 = smov 32   ;;  %vm28_vm4 = vcmask 654848  }
   0x5   :  { %v66_v7 = vld [vmem:[%s122_s0 + $0x1] ss:$8 sm:%s43_s25]   ;;  %s81_s0 = smov 16   ;;  %vm34_vm5 = vcmask 523648   ;;  %vm40_vm6 = vcmask 392448   ;;  %vm47_vm7 = vcmask 261248  }
   0x6   :  { %14 = vrot.lane.b32.xlu0 %v61_v2, %s77_s17  ;;  %26 = vrot.lane.b32.xlu1 %v63_v3, %s78_s18 }
   0xa   :  { %32 = vrot.lane.b32.xlu0 %v64_v5, %s79_s26  ;;  %38 = vrot.lane.b32.xlu1 %v65_v6, %s80_s27 }
   0xe   :  { %45 = vrot.lane.b32.xlu0 %v66_v7, %s81_s0 }
  0x74   :  { %v9_v8 = vpop.permute.xlu0 %8   ;;  %v21_v9 = vpop.permute.xlu1 %20  }
  0x75   :  { %11 = vst.msk [vmem:[#allocation0] sm:$0x1] %vm10_vm1, %v9_v8  }
  0x78   :  { %v15_v10 = vpop.permute.xlu0 %14   ;;  %v27_v11 = vpop.permute.xlu1 %26  }
  0x79   :  { %17 = vst.msk [vmem:[#allocation0] sm:$0x1] %vm16_vm2, %v15_v10  }
  0x7a   :  { %23 = vst.msk [vmem:[#allocation0] sm:$0x1] %vm22_vm3, %v21_v9  }
  0x7b   :  { %29 = vst.msk [vmem:[#allocation0] sm:$0x1] %vm28_vm4, %v27_v11  }
  0x7c   :  { %v33_v12 = vpop.permute.xlu0 %32   ;;  %v39_v13 = vpop.permute.xlu1 %38  }
  0x7d   :  { %35 = vst.msk [vmem:[#allocation0] sm:$0x1] %vm34_vm5, %v33_v12  }
  0x7e   :  { %41 = vst.msk [vmem:[#allocation0] sm:$0x1] %vm40_vm6, %v39_v13  }
  0x80   :  { %v46_v14 = vpop.permute.xlu0 %45  }
  0x81   :  { %48 = vst.msk [vmem:[#allocation0] ss:$8 sm:$0x3] %vm47_vm7, %v46_v14  }
  0x88   :  { %v52_v15 = vld [vmem:[#allocation0] sm:$0x1]  ;;  %v56_v16 = vld [vmem:[#allocation0 + $0x8] sm:$0x1] }
  0x89   :  { %54 = vst [vmem:[%s123_s1] sm:$0x1] %v52_v15  ;;  %67 = vst [vmem:[%s123_s1 + $0x1] sm:$0x1] %v56_v16 }

// kernel: vdp_lenet_forward.1
= control target key start
LH: loop header
LB: loop body
LE: loop exit
PB: predicated region body
PF: predicated region fallthrough
CT: control target
= control target key end

     0   :  { %s5753_s0 = inlined_call_operand.vmem [shape: f32[2,32,32], index: 0, kind: input, shape index: {}]   ;;  %s5754_s1 = inlined_call_operand.vmem [shape: f32[5,32,168], index: 1, kind: input, shape index: {}]   ;;  %s5755_s2 = inlined_call_operand.vmem [shape: f32[1,168], index: 2, kind: input, shape index: {}]   ;;  %s5756_s3 = inlined_call_operand.vmem [shape: f32[14,28], index: 3, kind: input, shape index: {}]   ;;  %s5757_s4 = inlined_call_operand.vmem [shape: f32[14,28], index: 4, kind: input, shape index: {}]   ;;  %s5758_s5 = inlined_call_operand.vmem [shape: f32[168,84], index: 5, kind: input, shape index: {}]   ;;  %s5759_s6 = inlined_call_operand.vmem [shape: f32[168,84], index: 6, kind: input, shape index: {}]   ;;  %s5760_s7 = inlined_call_operand.vmem [shape: f32[5,84,160], index: 7, kind: input, shape index: {}]   ;;  %s5761_s8 = inlined_call_operand.vmem [shape: f32[1,160], index: 8, kind: input, shape index: {}]   ;;  %s5762_s9 = inlined_call_operand.vmem [shape: f32[5,10], index: 9, kind: input, shape index: {}]   ;;  %s5763_s10 = inlined_call_operand.vmem [shape: f32[5,10], index: 10, kind: input, shape index: {}]   ;;  %s5764_s11 = inlined_call_operand.vmem [shape: f32[160,80], index: 11, kind: input, shape index: {}]   ;;  %s5765_s12 = inlined_call_operand.vmem [shape: f32[160,80], index: 12, kind: input, shape index: {}]   ;;  %s5766_s13 = inlined_call_operand.vmem [shape: f32[5,80,120], index: 13, kind: input, shape index: {}]   ;;  %s5767_s14 = inlined_call_operand.vmem [shape: f32[1,120], index: 14, kind: input, shape index: {}]   ;;  %s5768_s15 = inlined_call_operand.vmem [shape: f32[120,84], index: 15, kind: input, shape index: {}]   ;;  %s5769_s16 = inlined_call_operand.vmem [shape: f32[1,84], index: 16, kind: input, shape index: {}]   ;;  %s5770_s17 = inlined_call_operand.vmem [shape: f32[84,10], index: 17, kind: input, shape index: {}]   ;;  %s5771_s18 = inlined_call_operand.vmem [shape: f32[1,10], index: 18, kind: input, shape index: {}]   ;;  %s5772_s19 = inlined_call_operand.hbm [shape: f32[2,1,10], index: 19, kind: output, shape index: {}]  }
   0x1   :  { %5785 = sst [smem:[#allocation12_spill]] %s5753_s0 }
   0x2   :  { %5786 = sst [smem:[#allocation13_spill]] %s5754_s1 }
   0x3   :  { %5787 = sst [smem:[#allocation14_spill]] %s5755_s2 }
   0x4   :  { %5788 = sst [smem:[#allocation15_spill]] %s5756_s3 }
   0x5   :  { %5789 = sst [smem:[#allocation16_spill]] %s5772_s19 }
   0x6   :  { %24 = vsyncpa [#allocation3], 0 }
   0x7   :  { %26 = vsyncpa [#allocation3 + $0x1], 0  ;;  %s4391_s0 = smov 0   ;;  %s4393_s30 = smov 0  }
   0x8   :  { %s4395_s20 = smov 0   ;;  %s4397_s21 = smov 0  }
   0x9 LB: > { %5790 = sst [smem:[#allocation5_spill]] %s4272_s0  ;;  %s4412_s1 = sadd.s32 4294967295, %s4284_s21   ;;  %s4284_s21 = sphi %s4397_s21, %s5809_s21   ;;  %s4280_s20 = sphi %s4395_s20, %s5811_s20   ;;  %s4276_s30 = sphi %s4393_s30, %s5813_s30   ;;  %s4272_s0 = sphi %s4391_s0, %s5812_s0  }
   0xa   : > { %5791 = sst [smem:[#allocation6_spill]] %s4280_s20  ;;  %s3230_s22 = sadd.s32 4294967294, %s4284_s21  }
   0xb   : > { %5792 = sst [smem:[#allocation7_spill]] %s4284_s21  ;;  %s4416_s2 = sadd.s32 1, %s4284_s21  }
   0xc   : > { %5793 = sst [smem:[#allocation8_spill]] %s4416_s2  ;;  %s443_s23 = sadd.s32 1, %s4280_s20 }
   0xd   : > { %s440_s24 = ssub.s32 %s4284_s21, %s4416_s2  ;;  %p453_p0 = scmp.ne.s32.totalorder %s4280_s20, %s4276_s30 }
   0xe   : > { %p441_p1 = scmp.eq.s32.totalorder %s440_s24, 0  ;;  %p454_p2 = scmp.eq.s32.totalorder %s4412_s1, 1 }
   0xf   : > { %p459_p3 = scmp.ne.s32.totalorder %s4276_s30, %s4272_s0  ;;  %p460_p4 = scmp.eq.s32.totalorder %s3230_s22, 1 }
  0x10   : > { %s4427_s25 = scalar_select %p441_p1, %s4280_s20, %s443_s23  }
  0x11   : > { %p4429_p5 = por %p454_p2, %p453_p0  ;;  %p4433_p6 = por %p460_p4, %p459_p3 }
  0x12   : > { %5794 = sst [smem:[#allocation9_spill]] %s4427_s25  ;;  %p3233_p7 = scmp.ge.s32.totalorder %s4284_s21, 1 }
  0x13   : > { %s5795_s3 = scalar_select %p4429_p5, 1, 0 }
  0x14   : > { %s5797_s26 = scalar_select %p4433_p6, 1, 0 }
  0x15   : > { %5796 = sst [smem:[#allocation10_spill]] %s5795_s3  ;;  %p540_p8 = scmp.lt.s32.totalorder %s4284_s21, 3 }
  0x16   : > { %5798 = sst [smem:[#allocation11_spill]] %s5797_s26 }
  0x17   : > { %p541_p9 = pnand %p3233_p7, %p540_p8 }
  0x18   : > { %s5799_s29 = sld [smem:[#allocation13_spill]] (!%p541_p9)  ;;  %p595_p10 = scmp.lt.s32.totalorder (!%p541_p9), %s4412_s1, 1  ;;  %v4286_v7 = vmov (!%p541_p9), 0.0   ;;  %vm625_vm0 = vcmask (!%p541_p9), 1046528   ;;  %vm633_vm1 = vcmask (!%p541_p9), 261120   ;;  %vm1081_vm2 = vcmask (!%p541_p9), 1043456  }
  0x19   : > { %544 = sbr.rel (%p541_p9) target bundleno = 2634 (0xa4a), region = 96  ;;  %706 = vmatprep.mubr.f32.mxu0 (!%p541_p9), %v4286_v7  ;;  %1301 = vmatprep.mubr.f32.mxu1 (!%p541_p9), %v4286_v7  ;;  %s5800_s2 = sld [smem:[#allocation12_spill]] (!%p541_p9)  ;;  %vm837_vm3 = vcmask (!%p541_p9), 1045504   ;;  %vm959_vm4 = vcmask (!%p541_p9), 1044480   ;;  %vm4287_vm5 = vmmov (!%p541_p9), 1   ;;  %vm1224_vm7 = vcmask (!%p541_p9), 228352  }
  0x1a   : > { %vm3769_vm6 = vmpackc.low (!%p541_p9), %vm1081_vm2, %vm4287_vm5  ;;  %s5802_s20 = sld [smem:[#allocation15_spill]] (!%p541_p9)  ;;  %vm1424_vm8 = vcmask (!%p541_p9), 326656   ;;  %vm1654_vm9 = vcmask (!%p541_p9), 687104   ;;  %vm2205_vm10 = vcmask (!%p541_p9), 1041408   ;;  %vm2201_vm12 = vcmask (!%p541_p9), 80896   ;;  %s593_s24 = sand.u32 (!%p541_p9), 1, %s4276_s30  }
  0x1b   : > { %vm3945_vm11 = vmpackc.low (!%p541_p9), %vm2205_vm10, %vm4287_vm5  ;;  %vm4289_vm13 = vmmov (!%p541_p9), 0   ;;  %vm2567_vm14 = vcmask (!%p541_p9), 654336   ;;  %vm2986_vm15 = vcmask (!%p541_p9), 982016   ;;  %s3464_s27 = sshll.u32 (!%p541_p9), %s4412_s1, 4  ;;  %s5805_s25 = sld [smem:[#allocation16_spill]] (!%p541_p9) }
  0x1e   : > { %v3237_v0 = vld [vmem:[%s5799_s29 + $0x48] sm:$0xff] (!%p541_p9)  ;;  %v3239_v1 = vld [vmem:[%s5799_s29 + $0x58] sm:$0xff] (!%p541_p9)  ;;  %v3236_v2 = vld [vmem:[%s5799_s29 + $0x40] sm:$0xff] (!%p541_p9) }
  0x1f   : > { %v3724_v3 = vpack.c.bf16 (!%p541_p9), %v3239_v1, %v3237_v0  ;;  %v3238_v4 = vld [vmem:[%s5799_s29 + $0x50] sm:$0xff] (!%p541_p9)  ;;  %v3241_v5 = vld [vmem:[%s5799_s29 + $0x68] sm:$0xff] (!%p541_p9)  ;;  %v3243_v6 = vld [vmem:[%s5799_s29 + $0x78] sm:$0xff] (!%p541_p9) }
  0x20   : > { %v3726_v8 = vpack.c.bf16 %v3238_v4, %v3236_v2  ;;  %v3728_v9 = vpack.c.bf16 %v3243_v6, %v3241_v5  ;;  %v3240_v10 = vld [vmem:[%s5799_s29 + $0x60] sm:$0xff]  ;;  %v3242_v11 = vld [vmem:[%s5799_s29 + $0x70] sm:$0xff]  ;;  %s596_s0 = scalar_select %p595_p10, %s4412_s1, 1  ;;  %v605_v12 = vld [vmem:[%s5799_s29 + $0x8] sm:$0xff] }
  0x21   : > { %3725 = vmatprep.subr.bf16.mxu0 %v3724_v3  ;;  %v607_v13 = vld [vmem:[%s5799_s29 + $0x18] sm:$0xff]  ;;  %v3730_v14 = vpack.c.bf16 %v3242_v11, %v3240_v10  ;;  %v604_v15 = vld [vmem:[%s5799_s29] sm:$0xff]  ;;  %v606_v17 = vld [vmem:[%s5799_s29 + $0x10] sm:$0xff]  ;;  %s5710_s22 = scalar_lea.hbm %s5805_s25, %s3464_s27  ;;  %s4290_s1 = smov [#allocation2]  }
  0x22   : > { %3727 = vmatpush1.bf16.msra.mxu0 %v3726_v8  ;;  %s3467_s28 = sshll.u32 %s596_s0, 5  ;;  %v3732_v16 = vpack.c.bf16 %v607_v13, %v605_v12  ;;  %v609_v18 = vld [vmem:[%s5799_s29 + $0x28] sm:$0xff]  ;;  %v611_v19 = vld [vmem:[%s5799_s29 + $0x38] sm:$0xff]  ;;  %v3734_v26 = vpack.c.bf16 %v606_v17, %v604_v15  ;;  %v608_v30 = vld [vmem:[%s5799_s29 + $0x20] sm:$0xff]  ;;  %s594_s0 = scalar_lea.vmem [#allocation2], %s593_s24 }
  0x23   : > { %3729 = vmatprep.subr.bf16.mxu0 %v3728_v9  ;;  %s599_s19 = scalar_lea.vmem %s5800_s2, %s3467_s28  ;;  %v3736_v29 = vpack.c.bf16 %v611_v19, %v609_v18  ;;  %v610_v31 = vld [vmem:[%s5799_s29 + $0x30] sm:$0xff]  ;;  %v3253_v32 = vld [vmem:[%s5799_s29 + $0x88] sm:$0xff]  ;;  %v3255_v33 = vld [vmem:[%s5799_s29 + $0x98] sm:$0xff]  ;;  %s5801_s28 = sld [smem:[#allocation14_spill]] }
  0x24   : > { %v4488_v20 = vld [vmem:[%s599_s19] sm:$0xff]  ;;  %v4490_v21 = vld [vmem:[%s599_s19 + $0x8] sm:$0xff]  ;;  %v4492_v22 = vld [vmem:[%s599_s19 + $0x10] sm:$0xff]  ;;  %v3738_v36 = vpack.c.bf16 %v610_v31, %v608_v30  ;;  %v3740_v37 = vpack.c.bf16 %v3255_v33, %v3253_v32  ;;  %v1196_v31 = vlaneseq  ;;  %s5803_s2 = smov %s5802_s20  ;;  %s3175_s21 = sshll.u32 %s594_s0, 4  ;;  %s5712_s21 = int_to_ptr.vmem [resolvable:$true] %s3175_s21 }
  0x25   : > { %v626_v23 = vrot.slane %v4488_v20, 1  ;;  %v627_v24 = vrot.slane %v4490_v21, 1  ;;  %v629_v25 = vrot.slane %v4492_v22, 1  ;;  %v4498_v28 = vld [vmem:[%s599_s19 + $0x18] sm:$0xff]  ;;  %v1082_v38 = vrot.slane %v4488_v20, 4  ;;  %v3252_v46 = vld [vmem:[%s5799_s29 + $0x80] sm:$0xff] }
  0x26   : > { %3731 = vmatpush1.bf16.msra.mxu0 %v3730_v14  ;;  %v631_v35 = vrot.slane %v4498_v28, 1  ;;  %v1083_v39 = vrot.slane %v4490_v21, 4  ;;  %v1085_v40 = vrot.slane %v4492_v22, 4  ;;  %v1087_v42 = vrot.slane %v4498_v28, 4  ;;  %v3254_v47 = vld [vmem:[%s5799_s29 + $0x90] sm:$0xff]  ;;  %v3257_v48 = vld [vmem:[%s5799_s29 + $0xa8] sm:$0xff] }
  0x27   : > { %v628_v27 = vsel %vm625_vm0, %v626_v23, %v627_v24  ;;  %3733 = vmatprep.subr.bf16.mxu0 %v3732_v16  ;;  %v630_v34 = vsel %vm625_vm0, %v627_v24, %v629_v25  ;;  %v3259_v49 = vld [vmem:[%s5799_s29 + $0xb8] sm:$0xff]  ;;  %v3742_v50 = vpack.c.bf16 %v3254_v47, %v3252_v46  ;;  %v3256_v52 = vld [vmem:[%s5799_s29 + $0xa0] sm:$0xff]  ;;  %v3258_v53 = vld [vmem:[%s5799_s29 + $0xb0] sm:$0xff]  ;;  %v838_v58 = vrot.slane %v4488_v20, 2  ;;  %s4222_s26 = scalar_lea.vmem %s5712_s21, 16  ;;  %s4226_s19 = sshll.u32 %s4290_s1, 4  ;;  %s4227_s19 = int_to_ptr.vmem [resolvable:$false] %s4226_s19 }
  0x28   : > { %v632_v41 = vsel %vm625_vm0, %v629_v25, %v631_v35  ;;  %v4524_v43 = vsel %vm1081_vm2, %v1082_v38, %v1083_v39  ;;  %v4527_v44 = vsel %vm1081_vm2, %v1083_v39, %v1085_v40  ;;  %v4532_v45 = vsel %vm1081_vm2, %v1085_v40, %v1087_v42  ;;  %v3265_v54 = vld [vmem:[%s5799_s29 + $0xc8] sm:$0xff]  ;;  %v3267_v55 = vld [vmem:[%s5799_s29 + $0xd8] sm:$0xff]  ;;  %v3264_v60 = vld [vmem:[%s5799_s29 + $0xc0] sm:$0xff]  ;;  %p4223_p11 = scmp.ne.s32.totalorder %s5712_s21, %s4222_s26  ;;  %p4229_p0 = scmp.lt.s32.totalorder %s5712_s21, %s4227_s19 }
  0x29   : > { %3244 = vmatmul.mubr.msk.f32.vlgmr.msra.gmra.mrb[0].mxu0 %vm633_vm1, %v628_v27  ;;  %v3744_v51 = vpack.c.bf16 %v3259_v49, %v3257_v48  ;;  %v3746_v56 = vpack.c.bf16 %v3258_v53, %v3256_v52  ;;  %v3748_v57 = vpack.c.bf16 %v3267_v55, %v3265_v54  ;;  %v839_v59 = vrot.slane %v4490_v21, 2  ;;  %v3266_v61 = vld [vmem:[%s5799_s29 + $0xd0] sm:$0xff]  ;;  %v3269_v62 = vld [vmem:[%s5799_s29 + $0xe8] sm:$0xff]  ;;  %v3271_v63 = vld [vmem:[%s5799_s29 + $0xf8] sm:$0xff] }
  0x2a   : > { %712 = vmatprep.mubr.f32.mxu0 %v4286_v7  ;;  %3735 = vmatpush1.bf16.msra.mxu0 %v3734_v26  ;;  %v841_v1 = vrot.slane %v4492_v22, 2  ;;  %v3750_v2 = vpack.c.bf16 %v3266_v61, %v3264_v60  ;;  %v3752_v3 = vpack.c.bf16 %v3271_v63, %v3269_v62  ;;  %v3268_v4 = vld [vmem:[%s5799_s29 + $0xe0] sm:$0xff]  ;;  %v3270_v5 = vld [vmem:[%s5799_s29 + $0xf0] sm:$0xff]  ;;  %v3277_v6 = vld [vmem:[%s5799_s29 + $0x108] sm:$0xff]  ;;  %v843_v10 = vrot.slane %v4498_v28, 2  ;;  %p4224_p12 = pnand %p4223_p11, %p4429_p5 }
  0x2b   : > { %3737 = vmatprep.subr.bf16.mxu0 %v3736_v29  ;;  %v840_v0 = vsel %vm837_vm3, %v838_v58, %v839_v59  ;;  %v3279_v8 = vld [vmem:[%s5799_s29 + $0x118] sm:$0xff]  ;;  %v3754_v11 = vpack.c.bf16 %v3270_v5, %v3268_v4  ;;  %v960_v14 = vrot.slane %v4488_v20, 3  ;;  %v961_v15 = vrot.slane %v4490_v21, 3  ;;  %v3276_v16 = vld [vmem:[%s5799_s29 + $0x100] sm:$0xff]  ;;  %v3278_v17 = vld [vmem:[%s5799_s29 + $0x110] sm:$0xff] }
  0x2c   : > { %v842_v9 = vsel %vm837_vm3, %v839_v59, %v841_v1  ;;  %v3756_v12 = vpack.c.bf16 %v3279_v8, %v3277_v6  ;;  %v844_v13 = vsel %vm837_vm3, %v841_v1, %v843_v10  ;;  %v3281_v18 = vld [vmem:[%s5799_s29 + $0x128] sm:$0xff]  ;;  %v3283_v19 = vld [vmem:[%s5799_s29 + $0x138] sm:$0xff]  ;;  %v3758_v23 = vpack.c.bf16 %v3278_v17, %v3276_v16  ;;  %v3280_v25 = vld [vmem:[%s5799_s29 + $0x120] sm:$0xff]  ;;  %p4225_p13 = pneg %p4224_p12 }
  0x2d   : > { %3245 = vmatmul.mubr.msk.f32.gmra.mrb[2].mxu0 %vm633_vm1, %v630_v34  ;;  %v3760_v24 = vpack.c.bf16 %v3283_v19, %v3281_v18  ;;  %v3282_v26 = vld [vmem:[%s5799_s29 + $0x130] sm:$0xff]  ;;  %v965_v29 = vrot.slane %v4498_v28, 3  ;;  %v4659_v32 = vshrl.u32 %v1196_v31, 7  ;;  %v1194_v34 = vld [vmem:[%s5801_s28] sm:$0x3]  ;;  %v1404_v4 = vld [vmem:[%s5758_s5 + $0x8] sm:$0xff] }
  0x2e   : > { %718 = vmatprep.mubr.f32.mxu0 %v4286_v7  ;;  %3739 = vmatpush1.bf16.msra.mxu0 %v3738_v36  ;;  %v1222_v1 = vld [vmem:[%s5802_s20] sm:$0xff]  ;;  %v4288_v8 = vmov 0.0|0.0   ;;  %v1409_v16 = vld [vmem:[%s5758_s5 + $0x30] sm:$0xff]  ;;  %v1410_v17 = vld [vmem:[%s5758_s5 + $0x38] sm:$0xff]  ;;  %s3163_s20 = scalar_lea.sflag [#allocation3], %s593_s24 }
  0x2f   : > { %3741 = vmatprep.subr.bf16.mxu0 %v3740_v37  ;;  %v1198_v33 = vsub.s32 0, %v4659_v32  ;;  %v1314_v5 = vld [vmem:[%s5757_s4] sm:$0xff]  ;;  %v3794_v18 = vpack.c.bf16 %v1410_v17, %v1409_v16  ;;  %v1523_v16 = vld [vmem:[%s5759_s6 + $0x88] sm:$0xff] }
  0x30   : > { %v1411_v19 = vld [vmem:[%s5758_s5 + $0x40] sm:$0xff] }
  0x31   : > { %3246 = vmatmul.mubr.msk.f32.gmra.mrb[4].mxu0 %vm633_vm1, %v632_v41  ;;  %v1199_v36 = vrot.slane %v1194_v34, %v1198_v33 }
  0x32   : > { %724 = vmatprep.mubr.f32.mxu0 %v4286_v7 }
  0x35   : > { %3247 = vmatmul.mubr.msk.f32.gmra.mrb[6].mxu0 %vm633_vm1, %v631_v35  ;;  %v1202_v35 = vsub.s32 1, %v4659_v32  ;;  %v2200_v32 = vld [vmem:[%s5762_s9] sm:$0x1f] }
  0x36   : > { %803 = vmatprep.mubr.f32.mxu0 %v4286_v7 }
  0x39   : > { %3248 = vmatmul.mubr.msk.f32.vlgmr.msra.gmra.mrb[0].mxu0 %vm633_vm1, %v4488_v20  ;;  %v962_v20 = vsel %vm959_vm4, %v960_v14, %v961_v15  ;;  %v1408_v14 = vld [vmem:[%s5758_s5 + $0x28] sm:$0xff] }
  0x3a   : > { %809 = vmatprep.mubr.f32.mxu0 %v4286_v7  ;;  %3743 = vmatpush1.bf16.msra.mxu0 %v3742_v50 }
  0x3b   : > { %3745 = vmatprep.subr.bf16.mxu0 %v3744_v51 }
  0x3d   : > { %3249 = vmatmul.mubr.msk.f32.gmra.mrb[2].mxu0 %vm633_vm1, %v4490_v21  ;;  %v963_v21 = vrot.slane %v4492_v22, 3 }
  0x3e   : > { %815 = vmatprep.mubr.f32.mxu0 %v4286_v7  ;;  %3747 = vmatpush1.bf16.msra.mxu0 %v3746_v56 }
  0x3f   : > { %3749 = vmatprep.subr.bf16.mxu0 %v3748_v57  ;;  %v964_v27 = vsel %vm959_vm4, %v961_v15, %v963_v21  ;;  %v966_v30 = vsel %vm959_vm4, %v963_v21, %v965_v29 }
  0x41   : > { %3250 = vmatmul.mubr.msk.f32.gmra.mrb[4].mxu0 %vm633_vm1, %v4492_v22  ;;  %v3762_v22 = vpack.c.bf16 %v3282_v26, %v3280_v25  ;;  %v1415_v26 = vld [vmem:[%s5758_s5 + $0x60] sm:$0xff] }
  0x42   : > { %821 = vmatprep.mubr.f32.mxu0 %v4286_v7 }
  0x45   : > { %3251 = vmatmul.mubr.msk.f32.gmra.mrb[6].mxu0 %vm633_vm1, %v4498_v28  ;;  %v1203_v28 = vrot.slane %v1194_v34, %v1202_v35  ;;  %v1419_v34 = vld [vmem:[%s5758_s5 + $0x80] sm:$0xff] }
  0x46   : > { %917 = vmatprep.mubr.f32.mxu0 %v4286_v7 }
  0x49   : > { %3260 = vmatmul.mubr.msk.f32.vlgmr.msra.gmra.mrb[0].mxu0 %vm633_vm1, %v840_v0 }
  0x4a   : > { %923 = vmatprep.mubr.f32.mxu0 %v4286_v7  ;;  %3751 = vmatpush1.bf16.msra.mxu0 %v3750_v2  ;;  %v1223_v2 = vld [vmem:[%s5803_s2 + $0x8] sm:$0x3f]  ;;  %s4228_s2 = scalar_lea.vmem %s4227_s19, 32 }
  0x4b   : > { %3753 = vmatprep.subr.bf16.mxu0 %v3752_v3  ;;  %v1403_v3 = vld [vmem:[%s5758_s5] sm:$0xff]  ;;  %p4230_p1 = scmp.lt.s32.totalorder %s4228_s2, %s4222_s26 }
  0x4c   : > { %v3785_v6 = vpack.c.bf16 %v1404_v4, %v1403_v3  ;;  %v1516_v4 = vld [vmem:[%s5759_s6 + $0x50] sm:$0xff] }
  0x4d   : > { %3261 = vmatmul.mubr.msk.f32.gmra.mrb[2].mxu0 %vm633_vm1, %v842_v9  ;;  %v1405_v9 = vld [vmem:[%s5758_s5 + $0x10] sm:$0xff]  ;;  %p4231_p2 = por %p4230_p1, %p4229_p0 }
  0x4e   : > { %929 = vmatprep.mubr.f32.mxu0 %v4286_v7  ;;  %3755 = vmatpush1.bf16.msra.mxu0 %v3754_v11  ;;  %v1315_v11 = vld [vmem:[%s5757_s4 + $0x8] sm:$0x3f] }
  0x4f   : > { %3757 = vmatprep.subr.bf16.mxu0 %v3756_v12  ;;  %p4232_p3 = pnand %p4231_p2, %p4225_p13 }
  0x51   : > { %3262 = vmatmul.mubr.msk.f32.gmra.mrb[4].mxu0 %vm633_vm1, %v844_v13  ;;  %v1407_v13 = vld [vmem:[%s5758_s5 + $0x20] sm:$0xff] }
  0x52   : > { %935 = vmatprep.mubr.f32.mxu0 %v4286_v7  ;;  %v3791_v15 = vpack.c.bf16 %v1408_v14, %v1407_v13  ;;  %v1521_v13 = vld [vmem:[%s5759_s6 + $0x78] sm:$0xff] }
  0x55   : > { %3263 = vmatmul.mubr.msk.f32.gmra.mrb[6].mxu0 %vm633_vm1, %v843_v10  ;;  %v1406_v10 = vld [vmem:[%s5758_s5 + $0x18] sm:$0xff] }
  0x56   : > { %1039 = vmatprep.mubr.f32.mxu0 %v4286_v7  ;;  %v3788_v12 = vpack.c.bf16 %v1406_v10, %v1405_v9  ;;  %v1518_v9 = vld [vmem:[%s5759_s6 + $0x60] sm:$0xff]  ;;  %v1519_v10 = vld [vmem:[%s5759_s6 + $0x68] sm:$0xff] }
  0x59   : > { %3272 = vmatmul.mubr.msk.f32.vlgmr.msra.gmra.mrb[0].mxu0 %vm633_vm1, %v962_v20  ;;  %v1412_v20 = vld [vmem:[%s5758_s5 + $0x48] sm:$0xff] }
  0x5a   : > { %1045 = vmatprep.mubr.f32.mxu0 %v4286_v7  ;;  %3759 = vmatpush1.bf16.msra.mxu0 %v3758_v23  ;;  %v3797_v21 = vpack.c.bf16 %v1412_v20, %v1411_v19  ;;  %v1413_v23 = vld [vmem:[%s5758_s5 + $0x50] sm:$0xff]  ;;  %v1525_v19 = vld [vmem:[%s5759_s6 + $0x98] sm:$0xff] }
  0x5b   : > { %3761 = vmatprep.subr.bf16.mxu0 %v3760_v24  ;;  %v1414_v24 = vld [vmem:[%s5758_s5 + $0x58] sm:$0xff] }
  0x5c   : > { %v3800_v25 = vpack.c.bf16 %v1414_v24, %v1413_v23  ;;  %v3301_v23 = vld [vmem:[%s5760_s7 + $0xb8] sm:$0xff]  ;;  %v3303_v24 = vld [vmem:[%s5760_s7 + $0xc8] sm:$0xff] }
  0x5d   : > { %3273 = vmatmul.mubr.msk.f32.gmra.mrb[2].mxu0 %vm633_vm1, %v964_v27  ;;  %v1416_v27 = vld [vmem:[%s5758_s5 + $0x68] sm:$0xff] }
  0x5e   : > { %1051 = vmatprep.mubr.f32.mxu0 %v4286_v7  ;;  %3763 = vmatpush1.bf16.msra.mxu0 %v3762_v22  ;;  %v1417_v22 = vld [vmem:[%s5758_s5 + $0x70] sm:$0xff] }
  0x61   : > { %3274 = vmatmul.mubr.msk.f32.gmra.mrb[4].mxu0 %vm633_vm1, %v966_v30  ;;  %v1418_v30 = vld [vmem:[%s5758_s5 + $0x78] sm:$0xff] }
  0x62   : > { %1057 = vmatprep.mubr.f32.mxu0 %v4286_v7  ;;  %v3806_v31 = vpack.c.bf16 %v1418_v30, %v1417_v22  ;;  %v3307_v22 = vld [vmem:[%s5760_s7 + $0xe8] sm:$0xff] }
  0x65   : > { %3275 = vmatmul.mubr.msk.f32.gmra.mrb[6].mxu0 %vm633_vm1, %v965_v29  ;;  %v3803_v29 = vpack.c.bf16 %v1416_v27, %v1415_v26  ;;  %v3844_v26 = vpack.c.bf16 %v3303_v24, %v3301_v23  ;;  %v3302_v27 = vld [vmem:[%s5760_s7 + $0xc0] sm:$0xff]  ;;  %v1610_v24 = vld [vmem:[%s5760_s7 + $0x30] sm:$0xff] }
  0x66   : > { %1161 = vmatprep.mubr.f32.mxu0 %v4286_v7  ;;  %v1608_v23 = vld [vmem:[%s5760_s7 + $0x20] sm:$0xff] }
  0x67   : > { %3845 = vmatprep.subr.bf16.mxu0 %v3844_v26  ;;  %v1613_v26 = vld [vmem:[%s5760_s7 + $0x48] sm:$0xff] }
  0x69   : > { %3284 = vmatmul.mubr.msk.f32.vlgmr.msra.gmra.mrb[0].mxu0 %vm633_vm1, %v4524_v43 }
  0x6a   : > { %1167 = vmatprep.mubr.f32.mxu0 %v4286_v7 }
  0x6d   : > { %3285 = vmatmul.mubr.msk.f32.gmra.mrb[2].mxu0 %vm633_vm1, %v4527_v44 }
  0x6e   : > { %1173 = vmatprep.mubr.f32.mxu0 %v4286_v7 }
  0x71   : > { %3286 = vmatmul.mubr.msk.f32.gmra.mrb[4].mxu0 %vm633_vm1, %v4532_v45 }
  0x72   : > { %1179 = vmatprep.mubr.f32.mxu0 %v4286_v7 }
  0x75   : > { %3287 = vmatmul.mubr.msk.f32.gmra.mrb[6].mxu0 %vm633_vm1, %v1087_v42 }
  0x76   : > { %1729 = vmatprep.mubr.f32.mxu0 %v4286_v7 }
 0x13c   : > { %v1163_v37 = vpop.f32.mrb[0].mxu0 }
 0x13d   : > { %v1165_v38 = vpop.f32.mrb[1].mxu0  ;;  %v1206_v39 = vadd.f32 %v1199_v36, %v1163_v37 }
 0x13e   : > { %v1207_v40 = vadd.f32 %v1203_v28, %v1165_v38  ;;  %v1422_v38 = vld [vmem:[%s5758_s5 + $0x98] sm:$0xff] }
 0x13f   : > { %v1214_v45 = vmax.f32 %v1206_v39, 0.0 }
 0x140   : > { %v1169_v41 = vpop.f32.mrb[2].mxu0  ;;  %v1215_v47 = vmax.f32 %v1207_v40, 0.0  ;;  %v1423_v40 = vld [vmem:[%s5758_s5 + $0xa0] sm:$0xff] }
 0x141   : > { %v1208_v42 = vadd.f32 %v1199_v36, %v1169_v41  ;;  %v1171_v43 = vpop.f32.mrb[3].mxu0 }
 0x142   : > { %v1209_v44 = vadd.f32 %v1203_v28, %v1171_v43 }
 0x143   : > { %v1216_v46 = vmax.f32 %v1208_v42, 0.0 }
 0x144   : > { %v1217_v48 = vmax.f32 %v1209_v44, 0.0  ;;  %v1175_v49 = vpop.f32.mrb[4].mxu0 }
 0x145   : > { %v1177_v50 = vpop.f32.mrb[5].mxu0  ;;  %v3766_v51 = vpack.c.bf16 %v1216_v46, %v1214_v45  ;;  %v1210_v53 = vadd.f32 %v1199_v36, %v1175_v49  ;;  %v1506_v45 = vld [vmem:[%s5759_s6] sm:$0xff]  ;;  %v1507_v46 = vld [vmem:[%s5759_s6 + $0x8] sm:$0xff] }
 0x146   : > { %v3764_v52 = vpack.c.bf16 %v1217_v48, %v1215_v47  ;;  %v1211_v54 = vadd.f32 %v1203_v28, %v1177_v50 }
 0x147   : > { %v1218_v59 = vmax.f32 %v1210_v53, 0.0  ;;  %v1509_v53 = vld [vmem:[%s5759_s6 + $0x18] sm:$0xff] }
 0x148   : > { %v1181_v55 = vpop.f32.mrb[6].mxu0  ;;  %3765 = vmatprep.subr.bf16.mxu1 %v3764_v52  ;;  %v1219_v61 = vmax.f32 %v1211_v54, 0.0 }
 0x149   : > { %v1212_v56 = vadd.f32 %v1199_v36, %v1181_v55  ;;  %v1183_v57 = vpop.f32.mrb[7].mxu0  ;;  %3767 = vmatpush1.bf16.msra.mxu1 %v3766_v51  ;;  %v1420_v36 = vld [vmem:[%s5758_s5 + $0x88] sm:$0xff] }
 0x14a   : > { %v1213_v58 = vadd.f32 %v1203_v28, %v1183_v57  ;;  %v3809_v37 = vpack.c.bf16 %v1420_v36, %v1419_v34  ;;  %v1421_v28 = vld [vmem:[%s5758_s5 + $0x90] sm:$0xff]  ;;  %v3306_v36 = vld [vmem:[%s5760_s7 + $0xe0] sm:$0xff] }
 0x14b   : > { %v1220_v60 = vmax.f32 %v1212_v56, 0.0  ;;  %v3812_v39 = vpack.c.bf16 %v1422_v38, %v1421_v28  ;;  %v3304_v34 = vld [vmem:[%s5760_s7 + $0xd0] sm:$0xff]  ;;  %v3311_v28 = vld [vmem:[%s5760_s7 + $0x108] sm:$0xff] }
 0x14c   : > { %v1221_v62 = vmax.f32 %v1213_v58, 0.0  ;;  %v3850_v38 = vpack.c.bf16 %v3306_v36, %v3304_v34  ;;  %v1612_v36 = vld [vmem:[%s5760_s7 + $0x40] sm:$0xff] }
 0x14d   : > { %v3771_v63 = vpack.c.bf16 %v1220_v60, %v1218_v59  ;;  %v1510_v59 = vld [vmem:[%s5759_s6 + $0x20] sm:$0xff]  ;;  %v1511_v60 = vld [vmem:[%s5759_s6 + $0x28] sm:$0xff] }
 0x14e   : > { %v3768_v0 = vpack.c.bf16 %v1221_v62, %v1219_v61  ;;  %v3821_v61 = vpack.c.bf16 %v1511_v60, %v1510_v59  ;;  %v1512_v62 = vld [vmem:[%s5759_s6 + $0x30] sm:$0xff] }
 0x150   : > { %3770 = vmatprep.subr.msk.bf16.mxu1 %vm3769_vm6, %v3768_v0 }
 0x151   : > { %3773 = vmatpush1.bf16.msk.msra.mxu1 %vm3769_vm6, %v3771_v63 }
 0x152   : > { %3775 = vmatprep.subr.bf16.mxu1 %v3764_v52  ;;  %v1508_v52 = vld [vmem:[%s5759_s6 + $0x10] sm:$0xff] }
 0x153   : > { %v3818_v58 = vpack.c.bf16 %v1509_v53, %v1508_v52  ;;  %v3316_v52 = vld [vmem:[%s5760_s7 + $0x130] sm:$0xff]  ;;  %v3318_v53 = vld [vmem:[%s5760_s7 + $0x140] sm:$0xff] }
 0x154   : > { %3290 = vmatmul.mubr.msk.f32.vlgmr.msra.gmra.mrb[0].mxu1 %vm1224_vm7, %v1222_v1  ;;  %v1514_v1 = vld [vmem:[%s5759_s6 + $0x40] sm:$0xff] }
 0x155   : > { %3777 = vmatpush1.bf16.msra.mxu1 %v3766_v51  ;;  %1307 = vmatprep.mubr.f32.mxu1 %v4286_v7  ;;  %v3815_v51 = vpack.c.bf16 %v1507_v46, %v1506_v45  ;;  %v3312_v46 = vld [vmem:[%s5760_s7 + $0x110] sm:$0xff] }
 0x156   : > { %3780 = vmatprep.subr.msk.bf16.mxu1 %vm3769_vm6, %v3768_v0 }
 0x158   : > { %3291 = vmatmul.mubr.msk.f32.gmra.mrb[2].mxu1 %vm1224_vm7, %v1223_v2  ;;  %v1515_v2 = vld [vmem:[%s5759_s6 + $0x48] sm:$0xff] }
 0x159   : > { %3783 = vmatpush1.bf16.msk.msra.mxu1 %vm3769_vm6, %v3771_v63  ;;  %1386 = vmatprep.mubr.f32.mxu1 %v4286_v7  ;;  %v1513_v63 = vld [vmem:[%s5759_s6 + $0x38] sm:$0xff]  ;;  %v3827_v3 = vpack.c.bf16 %v1515_v2, %v1514_v1 }
 0x15a   : > { %3784 = vmatprep.subr.bf16.mxu1 %v4288_v8  ;;  %v3824_v0 = vpack.c.bf16 %v1513_v63, %v1512_v62 }
 0x15c   : > { %3294 = vmatmul.mubr.msk.f32.vlgmr.msra.gmra.mrb[4].mxu1 %vm1224_vm7, %v1314_v5  ;;  %v1517_v5 = vld [vmem:[%s5759_s6 + $0x58] sm:$0xff] }
 0x15d   : > { %1392 = vmatprep.mubr.f32.mxu1 %v4286_v7  ;;  %3786 = vmatpush1.bf16.msra.mxu1 %v3785_v6  ;;  %v3830_v6 = vpack.c.bf16 %v1517_v5, %v1516_v4  ;;  %v1606_v4 = vld [vmem:[%s5760_s7 + $0x10] sm:$0xff] }
 0x15e   : > { %3787 = vmatprep.subr.bf16.mxu1 %v4288_v8 }
 0x160   : > { %3295 = vmatmul.mubr.msk.f32.gmra.mrb[6].mxu1 %vm1224_vm7, %v1315_v11  ;;  %v3833_v11 = vpack.c.bf16 %v1519_v10, %v1518_v9 }
 0x161   : > { %3789 = vmatpush1.bf16.msra.mxu1 %v3788_v12  ;;  %v1520_v12 = vld [vmem:[%s5759_s6 + $0x70] sm:$0xff] }
 0x162   : > { %3790 = vmatprep.subr.bf16.mxu1 %v4288_v8  ;;  %v3836_v14 = vpack.c.bf16 %v1521_v13, %v1520_v12  ;;  %v1611_v12 = vld [vmem:[%s5760_s7 + $0x38] sm:$0xff] }
 0x165   : > { %3792 = vmatpush1.bf16.msra.mxu1 %v3791_v15  ;;  %v1522_v15 = vld [vmem:[%s5759_s6 + $0x80] sm:$0xff] }
 0x166   : > { %3793 = vmatprep.subr.bf16.mxu1 %v4288_v8  ;;  %v3839_v17 = vpack.c.bf16 %v1523_v16, %v1522_v15 }
 0x169   : > { %3795 = vmatpush1.bf16.msra.mxu1 %v3794_v18  ;;  %v1524_v18 = vld [vmem:[%s5759_s6 + $0x90] sm:$0xff] }
 0x16a   : > { %3796 = vmatprep.subr.bf16.mxu1 %v4288_v8  ;;  %v3842_v20 = vpack.c.bf16 %v1525_v19, %v1524_v18 }
 0x16d   : > { %3798 = vmatpush1.bf16.msra.mxu1 %v3797_v21  ;;  %v1526_v21 = vld [vmem:[%s5759_s6 + $0xa0] sm:$0xff] }
 0x16e   : > { %3799 = vmatprep.subr.bf16.mxu1 %v4288_v8 }
 0x171   : > { %3801 = vmatpush1.bf16.msra.mxu1 %v3800_v25  ;;  %v3300_v25 = vld [vmem:[%s5760_s7 + $0xb0] sm:$0xff] }
 0x172   : > { %3802 = vmatprep.subr.bf16.mxu1 %v4288_v8  ;;  %v3846_v30 = vpack.c.bf16 %v3302_v27, %v3300_v25  ;;  %v1615_v27 = vld [vmem:[%s5760_s7 + $0x58] sm:$0xff] }
 0x173   : > { %v3872_v34 = vpack.c.bf16 %v1615_v27, %v1613_v26  ;;  %v3357_v26 = vld [vmem:[%s5760_s7 + $0x218] sm:$0xff]  ;;  %v3359_v27 = vld [vmem:[%s5760_s7 + $0x228] sm:$0xff] }
 0x174   : > { %3847 = vmatpush1.bf16.msra.mxu0 %v3846_v30 }
 0x175   : > { %3804 = vmatpush1.bf16.msra.mxu1 %v3803_v29  ;;  %v3305_v29 = vld [vmem:[%s5760_s7 + $0xd8] sm:$0xff] }
 0x176   : > { %3805 = vmatprep.subr.bf16.mxu1 %v4288_v8 }
 0x179   : > { %3807 = vmatpush1.bf16.msra.mxu1 %v3806_v31  ;;  %v3848_v31 = vpack.c.bf16 %v3307_v22, %v3305_v29 }
 0x17a   : > { %3808 = vmatprep.subr.bf16.mxu1 %v4288_v8 }
 0x17b   : > { %3849 = vmatprep.subr.bf16.mxu0 %v3848_v31  ;;  %v3870_v31 = vpack.c.bf16 %v1610_v24, %v1608_v23  ;;  %v3348_v23 = vld [vmem:[%s5760_s7 + $0x1f0] sm:$0xff] }
 0x17c   : > { %3851 = vmatpush1.bf16.msra.mxu0 %v3850_v38  ;;  %v1619_v38 = vld [vmem:[%s5760_s7 + $0x78] sm:$0xff] }
 0x17d   : > { %3810 = vmatpush1.bf16.msra.mxu1 %v3809_v37  ;;  %v3309_v37 = vld [vmem:[%s5760_s7 + $0xf8] sm:$0xff] }
 0x17e   : > { %3811 = vmatprep.subr.bf16.mxu1 %v4288_v8 }
 0x181   : > { %3813 = vmatpush1.bf16.msra.mxu1 %v3812_v39  ;;  %v3852_v39 = vpack.c.bf16 %v3311_v28, %v3309_v37  ;;  %v1614_v37 = vld [vmem:[%s5760_s7 + $0x50] sm:$0xff]  ;;  %v1617_v28 = vld [vmem:[%s5760_s7 + $0x68] sm:$0xff] }
 0x182   : > { %1471 = vmatprep.subr.mxu1 %v4286_v7 }
 0x183   : > { %3853 = vmatprep.subr.bf16.mxu0 %v3852_v39  ;;  %v3874_v39 = vpack.c.bf16 %v1614_v37, %v1612_v36  ;;  %v3361_v36 = vld [vmem:[%s5760_s7 + $0x238] sm:$0xff]  ;;  %v3363_v37 = vld [vmem:[%s5760_s7 + $0x248] sm:$0xff] }
 0x185   : > { %1472 = vmatpush1.msra.mxu1 %v1423_v40  ;;  %v3308_v40 = vld [vmem:[%s5760_s7 + $0xf0] sm:$0xff] }
 0x186   : > { %3814 = vmatprep.subr.bf16.mxu1 %v4288_v8 }
 0x227   : > { %v1303_v41 = vpop.f32.mrb[0].mxu1 }
 0x228   : > { %v1305_v42 = vpop.f32.mrb[1].mxu1 }
 0x22b   : > { %v1309_v43 = vpop.f32.mrb[2].mxu1 }
 0x22c   : > { %v1311_v44 = vpop.f32.mrb[3].mxu1 }
 0x22f   : > { %v1388_v47 = vpop.f32.mrb[4].mxu1 }
 0x230   : > { %v1399_v48 = vmax.f32 %v1303_v41, %v1388_v47  ;;  %v1390_v49 = vpop.f32.mrb[5].mxu1  ;;  %v3310_v41 = vld [vmem:[%s5760_s7 + $0x100] sm:$0xff] }
 0x231   : > { %v1400_v50 = vmax.f32 %v1305_v42, %v1390_v49  ;;  %v3313_v42 = vld [vmem:[%s5760_s7 + $0x118] sm:$0xff]  ;;  %v3314_v47 = vld [vmem:[%s5760_s7 + $0x120] sm:$0xff] }
 0x232   : > { %v3317_v49 = vld [vmem:[%s5760_s7 + $0x138] sm:$0xff] }
 0x233   : > { %v1394_v54 = vpop.f32.mrb[6].mxu1  ;;  %3296 = vmatprep.mubr.msk.f32.mxu1 %vm1424_vm8, %v1400_v50 }
 0x234   : > { %v1401_v55 = vmax.f32 %v1309_v43, %v1394_v54  ;;  %v1396_v56 = vpop.f32.mrb[7].mxu1  ;;  %1496 = vmatmul.mubr.f32.vlgmr.msra.gmra.mrb[8].mxu1 %v1399_v48  ;;  %v3315_v43 = vld [vmem:[%s5760_s7 + $0x128] sm:$0xff]  ;;  %v3862_v54 = vpack.c.bf16 %v3318_v53, %v3316_v52  ;;  %v3333_v52 = vld [vmem:[%s5760_s7 + $0x178] sm:$0xff]  ;;  %v3330_v53 = vld [vmem:[%s5760_s7 + $0x160] sm:$0xff] }
 0x235   : > { %v1402_v57 = vmax.f32 %v1311_v44, %v1396_v56  ;;  %3816 = vmatpush1.bf16.msra.mxu1 %v3815_v51  ;;  %v3854_v44 = vpack.c.bf16 %v3310_v41, %v3308_v40  ;;  %v3856_v45 = vpack.c.bf16 %v3315_v43, %v3313_v42  ;;  %v3320_v56 = vld [vmem:[%s5760_s7 + $0x150] sm:$0xf]  ;;  %v3876_v40 = vpack.c.bf16 %v1619_v38, %v1617_v28  ;;  %v1616_v41 = vld [vmem:[%s5760_s7 + $0x60] sm:$0xff]  ;;  %v1621_v43 = vld [vmem:[%s5760_s7 + $0x88] sm:$0xff] }
 0x236   : > { %3817 = vmatprep.subr.bf16.mxu1 %v4288_v8  ;;  %v1618_v42 = vld [vmem:[%s5760_s7 + $0x70] sm:$0xff]  ;;  %v3350_v28 = vld [vmem:[%s5760_s7 + $0x200] sm:$0xf]  ;;  %v3904_v38 = vpack.c.bf16 %v3359_v27, %v3357_v26  ;;  %v3399_v27 = vld [vmem:[%s5760_s7 + $0x348] sm:$0xff] }
 0x237   : > { %3297 = vmatprep.mubr.msk.f32.mxu1 %vm1424_vm8, %v1402_v57  ;;  %3855 = vmatpush1.bf16.msra.mxu0 %v3854_v44  ;;  %v1623_v44 = vld [vmem:[%s5760_s7 + $0x98] sm:$0xff]  ;;  %v3396_v26 = vld [vmem:[%s5760_s7 + $0x330] sm:$0xff] }
 0x238   : > { %1501 = vmatmul.mubr.f32.gmra.mrb[10].mxu1 %v1401_v55  ;;  %3857 = vmatprep.subr.bf16.mxu0 %v3856_v45  ;;  %v3878_v45 = vpack.c.bf16 %v1618_v42, %v1616_v41  ;;  %v3360_v41 = vld [vmem:[%s5760_s7 + $0x230] sm:$0xff]  ;;  %v3362_v42 = vld [vmem:[%s5760_s7 + $0x240] sm:$0xff] }
 0x239   : > { %3819 = vmatpush1.bf16.msra.mxu1 %v3818_v58  ;;  %3298 = vmatprep.mubr.msk.f32.mxu1 %vm1424_vm8, %v1400_v50  ;;  %v3319_v50 = vld [vmem:[%s5760_s7 + $0x148] sm:$0xff]  ;;  %v1607_v58 = vld [vmem:[%s5760_s7 + $0x18] sm:$0xff] }
 0x23a   : > { %3820 = vmatprep.subr.bf16.mxu1 %v4288_v8  ;;  %v3860_v51 = vpack.c.bf16 %v3319_v50, %v3317_v49  ;;  %v1625_v50 = vld [vmem:[%s5760_s7 + $0xa8] sm:$0xf] }
 0x23d   : > { %3822 = vmatpush1.bf16.msra.mxu1 %v3821_v61 }
 0x23e   : > { %3823 = vmatprep.subr.bf16.mxu1 %v4288_v8 }
 0x241   : > { %3825 = vmatpush1.bf16.msra.mxu1 %v3824_v0 }
 0x242   : > { %3826 = vmatprep.subr.bf16.mxu1 %v4288_v8 }
 0x245   : > { %3828 = vmatpush1.bf16.msra.mxu1 %v3827_v3  ;;  %v1604_v3 = vld [vmem:[%s5760_s7] sm:$0xff] }
 0x246   : > { %3829 = vmatprep.subr.bf16.mxu1 %v4288_v8  ;;  %v3866_v10 = vpack.c.bf16 %v1606_v4, %v1604_v3  ;;  %v3338_v4 = vld [vmem:[%s5760_s7 + $0x1a0] sm:$0xff] }
 0x249   : > { %3831 = vmatpush1.bf16.msra.mxu1 %v3830_v6 }
 0x24a   : > { %3832 = vmatprep.subr.bf16.mxu1 %v4288_v8 }
 0x24d   : > { %3834 = vmatpush1.bf16.msra.mxu1 %v3833_v11  ;;  %v1609_v11 = vld [vmem:[%s5760_s7 + $0x28] sm:$0xff] }
 0x24e   : > { %3835 = vmatprep.subr.bf16.mxu1 %v4288_v8 }
 0x251   : > { %3837 = vmatpush1.bf16.msra.mxu1 %v3836_v14 }
 0x252   : > { %3838 = vmatprep.subr.bf16.mxu1 %v4288_v8 }
 0x255   : > { %3840 = vmatpush1.bf16.msra.mxu1 %v3839_v17 }
 0x256   : > { %3841 = vmatprep.subr.bf16.mxu1 %v4288_v8 }
 0x259   : > { %3843 = vmatpush1.bf16.msra.mxu1 %v3842_v20 }
 0x25a   : > { %1567 = vmatprep.subr.mxu1 %v4286_v7 }
 0x25d   : > { %1568 = vmatpush1.msra.mxu1 %v1526_v21  ;;  %v3868_v21 = vpack.c.bf16 %v1611_v12, %v1609_v11  ;;  %v3342_v12 = vld [vmem:[%s5760_s7 + $0x1c0] sm:$0xff] }
 0x25e   : > { %1592 = vmatmul.mubr.f32.vlgmr.msra.gmra.mrb[12].mxu1 %v1399_v48  ;;  %v3858_v48 = vpack.c.bf16 %v3314_v47, %v3312_v46  ;;  %v3880_v46 = vpack.c.bf16 %v1623_v44, %v1621_v43  ;;  %v1620_v47 = vld [vmem:[%s5760_s7 + $0x80] sm:$0xff]  ;;  %v3365_v43 = vld [vmem:[%s5760_s7 + $0x258] sm:$0xff]  ;;  %v3367_v44 = vld [vmem:[%s5760_s7 + $0x268] sm:$0xff] }
 0x25f   : > { %3299 = vmatprep.mubr.msk.f32.mxu1 %vm1424_vm8, %v1402_v57  ;;  %v1605_v57 = vld [vmem:[%s5760_s7 + $0x8] sm:$0xff] }
 0x260   : > { %3859 = vmatpush1.bf16.msra.mxu0 %v3858_v48  ;;  %v3864_v59 = vpack.c.bf16 %v1607_v58, %v1605_v57  ;;  %v1622_v48 = vld [vmem:[%s5760_s7 + $0x90] sm:$0xff]  ;;  %v1624_v57 = vld [vmem:[%s5760_s7 + $0xa0] sm:$0xf] }
 0x261   : > { %3861 = vmatprep.subr.bf16.mxu0 %v3860_v51  ;;  %v3882_v49 = vpack.c.bf16 %v1622_v48, %v1620_v47  ;;  %v3331_v51 = vld [vmem:[%s5760_s7 + $0x168] sm:$0xff]  ;;  %v3364_v47 = vld [vmem:[%s5760_s7 + $0x250] sm:$0xff]  ;;  %v3366_v48 = vld [vmem:[%s5760_s7 + $0x260] sm:$0xff] }
 0x262   : > { %1597 = vmatmul.mubr.f32.gmra.mrb[14].mxu1 %v1401_v55  ;;  %v3321_v55 = vld [vmem:[%s5760_s7 + $0x158] sm:$0xf]  ;;  %v3884_v58 = vpack.c.bf16 %v3333_v52, %v3331_v51  ;;  %v3368_v52 = vld [vmem:[%s5760_s7 + $0x270] sm:$0xff] }
 0x263   : > { %2276 = vmatprep.mubr.f32.mxu1 %v4286_v7 }
 0x264   : > { %3863 = vmatpush1.bf16.msra.mxu0 %v3862_v54  ;;  %v3332_v54 = vld [vmem:[%s5760_s7 + $0x170] sm:$0xff] }
 0x265   : > { %3322 = vmatprep.subr.msk.mxu0 %vm1081_vm2, %v3321_v55  ;;  %v3335_v55 = vld [vmem:[%s5760_s7 + $0x188] sm:$0xff] }
 0x268   : > { %3323 = vmatpush1.msk.msra.mxu0 %vm1081_vm2, %v3320_v56  ;;  %v3337_v56 = vld [vmem:[%s5760_s7 + $0x198] sm:$0xff] }
 0x269   : > { %3865 = vmatprep.subr.bf16.mxu0 %v3864_v59  ;;  %v3886_v59 = vpack.c.bf16 %v3332_v54, %v3330_v53  ;;  %v3370_v53 = vld [vmem:[%s5760_s7 + $0x280] sm:$0xff]  ;;  %v3373_v54 = vld [vmem:[%s5760_s7 + $0x298] sm:$0xff] }
 0x307   : > { %v1497_v60 = vpop.f32.mrb[8].mxu1 }
 0x308   : > { %v1499_v61 = vpop.f32.mrb[9].mxu1 }
 0x309   : > { %v3334_v61 = vld [vmem:[%s5760_s7 + $0x180] sm:$0xff] }
 0x30b   : > { %v1502_v62 = vpop.f32.mrb[10].mxu1 }
 0x30c   : > { %v1504_v63 = vpop.f32.mrb[11].mxu1 }
 0x30d   : > { %v3339_v63 = vld [vmem:[%s5760_s7 + $0x1a8] sm:$0xff] }
 0x331   : > { %v1593_v0 = vpop.f32.mrb[12].mxu1 }
 0x332   : > { %v4918_v1 = vmax.f32 %v1497_v60, %v1593_v0  ;;  %v1595_v2 = vpop.f32.mrb[13].mxu1  ;;  %v3888_v60 = vpack.c.bf16 %v3337_v56, %v3335_v55  ;;  %v3341_v0 = vld [vmem:[%s5760_s7 + $0x1b8] sm:$0xff]  ;;  %v3918_v55 = vpack.c.bf16 %v3370_v53, %v3368_v52  ;;  %v2361_v52 = vld [vmem:[%s5764_s11 + $0x8] sm:$0xff]  ;;  %v2283_v53 = vld [vmem:[%s5763_s10] sm:$0x1f] }
 0x333   : > { %v3892_v3 = vpack.c.bf16 %v3341_v0, %v3339_v63  ;;  %v3382_v63 = vld [vmem:[%s5760_s7 + $0x2c0] sm:$0xff]  ;;  %v3384_v0 = vld [vmem:[%s5760_s7 + $0x2d0] sm:$0xff] }
 0x334   : > { %v1651_v13 = vrot.slane %v4918_v1, 1  ;;  %v1852_v14 = vrot.slane %v4918_v1, 2  ;;  %v1969_v15 = vrot.slane %v4918_v1, 3  ;;  %v2086_v16 = vrot.slane %v4918_v1, 4 }
 0x335   : > { %v1598_v5 = vpop.f32.mrb[14].mxu1 }
 0x336   : > { %v4926_v6 = vmax.f32 %v1502_v62, %v1598_v5  ;;  %v1600_v9 = vpop.f32.mrb[15].mxu1  ;;  %v3336_v62 = vld [vmem:[%s5760_s7 + $0x190] sm:$0xff] }
 0x337   : > { %v3890_v2 = vpack.c.bf16 %v3336_v62, %v3334_v61  ;;  %v3340_v5 = vld [vmem:[%s5760_s7 + $0x1b0] sm:$0xff]  ;;  %v3343_v9 = vld [vmem:[%s5760_s7 + $0x1c8] sm:$0xff]  ;;  %v3385_v62 = vld [vmem:[%s5760_s7 + $0x2d8] sm:$0xff] }
 0x338   : > { %v1652_v17 = vrot.slane %v4926_v6, 1  ;;  %v1853_v18 = vrot.slane %v4926_v6, 2  ;;  %v1970_v19 = vrot.slane %v4926_v6, 3  ;;  %v2087_v20 = vrot.slane %v4926_v6, 4  ;;  %v3383_v61 = vld [vmem:[%s5760_s7 + $0x2c8] sm:$0xff] }
 0x33a   : > { %v1653_v25 = vsel %vm625_vm0, %v1651_v13, %v1652_v17  ;;  %v4958_v29 = vsel %vm837_vm3, %v1852_v14, %v1853_v18  ;;  %v4963_v22 = vsel %vm959_vm4, %v1969_v15, %v1970_v19  ;;  %v4968_v30 = vsel %vm1081_vm2, %v2086_v16, %v2087_v20  ;;  %v3344_v13 = vld [vmem:[%s5760_s7 + $0x1d0] sm:$0xff]  ;;  %v3347_v14 = vld [vmem:[%s5760_s7 + $0x1e8] sm:$0xff]  ;;  %v3349_v15 = vld [vmem:[%s5760_s7 + $0x1f8] sm:$0xff] }
 0x33b   : > { %3324 = vmatmul.mubr.msk.f32.vlgmr.msra.gmra.mrb[8].mxu0 %vm1654_vm9, %v1653_v25  ;;  %v3898_v16 = vpack.c.bf16 %v3344_v13, %v3342_v12  ;;  %v3351_v25 = vld [vmem:[%s5760_s7 + $0x208] sm:$0xf]  ;;  %v3393_v13 = vld [vmem:[%s5760_s7 + $0x318] sm:$0xff]  ;;  %vm3149_vm0 = vcmask 73728  }
 0x33c   : > { %3867 = vmatpush1.bf16.msra.mxu0 %v3866_v10  ;;  %1735 = vmatprep.mubr.f32.mxu0 %v4286_v7  ;;  %v3894_v10 = vpack.c.bf16 %v3340_v5, %v3338_v4  ;;  %v3376_v4 = vld [vmem:[%s5760_s7 + $0x2b0] sm:$0xf]  ;;  %v3924_v5 = vpack.c.bf16 %v3385_v62, %v3383_v61  ;;  %v3391_v12 = vld [vmem:[%s5760_s7 + $0x308] sm:$0xff]  ;;  %v2367_v61 = vld [vmem:[%s5764_s11 + $0x38] sm:$0xff] }
 0x33d   : > { %3869 = vmatprep.subr.bf16.mxu0 %v3868_v21  ;;  %v3346_v21 = vld [vmem:[%s5760_s7 + $0x1e0] sm:$0xff] }
 0x33e   : > { %v3902_v24 = vpack.c.bf16 %v3348_v23, %v3346_v21  ;;  %v3395_v21 = vld [vmem:[%s5760_s7 + $0x328] sm:$0xff] }
 0x33f   : > { %3325 = vmatmul.mubr.msk.f32.gmra.mrb[10].mxu0 %vm1654_vm9, %v1652_v17  ;;  %v3900_v17 = vpack.c.bf16 %v3349_v15, %v3347_v14  ;;  %v3932_v15 = vpack.c.bf16 %v3393_v13, %v3391_v12  ;;  %v2375_v12 = vld [vmem:[%s5764_s11 + $0x78] sm:$0xff] }
 0x340   : > { %3871 = vmatpush1.bf16.msra.mxu0 %v3870_v31  ;;  %1816 = vmatprep.mubr.f32.mxu0 %v4286_v7  ;;  %v3356_v31 = vld [vmem:[%s5760_s7 + $0x210] sm:$0xff] }
 0x341   : > { %3873 = vmatprep.subr.bf16.mxu0 %v3872_v34  ;;  %v3358_v34 = vld [vmem:[%s5760_s7 + $0x220] sm:$0xff] }
 0x344   : > { %3875 = vmatpush1.bf16.msra.mxu0 %v3874_v39  ;;  %v3906_v39 = vpack.c.bf16 %v3358_v34, %v3356_v31 }
 0x345   : > { %3877 = vmatprep.subr.bf16.mxu0 %v3876_v40  ;;  %v3908_v40 = vpack.c.bf16 %v3363_v37, %v3361_v36  ;;  %v3398_v36 = vld [vmem:[%s5760_s7 + $0x340] sm:$0xff]  ;;  %v3400_v37 = vld [vmem:[%s5760_s7 + $0x350] sm:$0xff] }
 0x348   : > { %3879 = vmatpush1.bf16.msra.mxu0 %v3878_v45  ;;  %v3910_v45 = vpack.c.bf16 %v3362_v42, %v3360_v41 }
 0x349   : > { %3881 = vmatprep.subr.bf16.mxu0 %v3880_v46  ;;  %v3912_v46 = vpack.c.bf16 %v3367_v44, %v3365_v43 }
 0x34c   : > { %3883 = vmatpush1.bf16.msra.mxu0 %v3882_v49  ;;  %v3369_v49 = vld [vmem:[%s5760_s7 + $0x278] sm:$0xff] }
 0x34d   : > { %3326 = vmatprep.subr.msk.mxu0 %vm1081_vm2, %v1625_v50  ;;  %v3914_v50 = vpack.c.bf16 %v3366_v48, %v3364_v47 }
 0x350   : > { %3327 = vmatpush1.msk.msra.mxu0 %vm1081_vm2, %v1624_v57  ;;  %v3372_v57 = vld [vmem:[%s5760_s7 + $0x290] sm:$0xff] }
 0x351   : > { %3328 = vmatmul.mubr.msk.f32.vlgmr.msra.gmra.mrb[8].mxu0 %vm1654_vm9, %v4918_v1  ;;  %3885 = vmatprep.subr.bf16.mxu0 %v3884_v58  ;;  %v3345_v1 = vld [vmem:[%s5760_s7 + $0x1d8] sm:$0xff]  ;;  %v3374_v58 = vld [vmem:[%s5760_s7 + $0x2a0] sm:$0xff] }
 0x352   : > { %3887 = vmatpush1.bf16.msra.mxu0 %v3886_v59  ;;  %1822 = vmatprep.mubr.f32.mxu0 %v4286_v7  ;;  %v3896_v11 = vpack.c.bf16 %v3345_v1, %v3343_v9  ;;  %v3922_v59 = vpack.c.bf16 %v3374_v58, %v3372_v57  ;;  %v3926_v9 = vpack.c.bf16 %v3384_v0, %v3382_v63  ;;  %v2364_v57 = vld [vmem:[%s5764_s11 + $0x20] sm:$0xff]  ;;  %v2365_v58 = vld [vmem:[%s5764_s11 + $0x28] sm:$0xff] }
 0x353   : > { %3889 = vmatprep.subr.bf16.mxu0 %v3888_v60  ;;  %v3377_v60 = vld [vmem:[%s5760_s7 + $0x2b8] sm:$0xf]  ;;  %v2368_v63 = vld [vmem:[%s5764_s11 + $0x40] sm:$0xff]  ;;  %v2369_v0 = vld [vmem:[%s5764_s11 + $0x48] sm:$0xff] }
 0x355   : > { %3329 = vmatmul.mubr.msk.f32.gmra.mrb[10].mxu0 %vm1654_vm9, %v4926_v6 }
 0x356   : > { %3891 = vmatpush1.bf16.msra.mxu0 %v3890_v2  ;;  %1929 = vmatprep.mubr.f32.mxu0 %v4286_v7  ;;  %v3387_v2 = vld [vmem:[%s5760_s7 + $0x2e8] sm:$0xff] }
 0x357   : > { %3893 = vmatprep.subr.bf16.mxu0 %v3892_v3  ;;  %v3389_v3 = vld [vmem:[%s5760_s7 + $0x2f8] sm:$0xff] }
 0x358   : > { %v3928_v1 = vpack.c.bf16 %v3389_v3, %v3387_v2  ;;  %v3969_v2 = vpack.c.bf16 %v2369_v0, %v2368_v63  ;;  %v2370_v3 = vld [vmem:[%s5764_s11 + $0x50] sm:$0xff]  ;;  %v3418_v63 = vld [vmem:[%s5766_s13 + $0x60] sm:$0xff]  ;;  %v3419_v0 = vld [vmem:[%s5766_s13 + $0x68] sm:$0xff] }
 0x35a   : > { %3895 = vmatpush1.bf16.msra.mxu0 %v3894_v10  ;;  %v3386_v10 = vld [vmem:[%s5760_s7 + $0x2e0] sm:$0xff] }
 0x35b   : > { %3897 = vmatprep.subr.bf16.mxu0 %v3896_v11  ;;  %v3388_v11 = vld [vmem:[%s5760_s7 + $0x2f0] sm:$0xff] }
 0x35c   : > { %v3930_v14 = vpack.c.bf16 %v3388_v11, %v3386_v10  ;;  %v2374_v11 = vld [vmem:[%s5764_s11 + $0x70] sm:$0xff] }
 0x35d   : > { %v3978_v13 = vpack.c.bf16 %v2375_v12, %v2374_v11  ;;  %v2550_v12 = vld [vmem:[%s5766_s13 + $0x30] sm:$0xff] }
 0x35e   : > { %3899 = vmatpush1.bf16.msra.mxu0 %v3898_v16  ;;  %v3390_v16 = vld [vmem:[%s5760_s7 + $0x300] sm:$0xff] }
 0x35f   : > { %3901 = vmatprep.subr.bf16.mxu0 %v3900_v17  ;;  %v3392_v17 = vld [vmem:[%s5760_s7 + $0x310] sm:$0xff] }
 0x360   : > { %v3934_v23 = vpack.c.bf16 %v3392_v17, %v3390_v16  ;;  %v2378_v17 = vld [vmem:[%s5764_s11 + $0x90] sm:$0xff] }
 0x362   : > { %3903 = vmatpush1.bf16.msra.mxu0 %v3902_v24 }
 0x363   : > { %3352 = vmatprep.subr.msk.mxu0 %vm1081_vm2, %v3351_v25  ;;  %v3394_v25 = vld [vmem:[%s5760_s7 + $0x320] sm:$0xff] }
 0x364   : > { %v3938_v31 = vpack.c.bf16 %v3396_v26, %v3394_v25  ;;  %v2453_v25 = vld [vmem:[%s5765_s12] sm:$0xff]  ;;  %v2454_v26 = vld [vmem:[%s5765_s12 + $0x8] sm:$0xff] }
 0x366   : > { %3353 = vmatpush1.msk.msra.mxu0 %vm1081_vm2, %v3350_v28  ;;  %v3942_v28 = vpack.c.bf16 %v3400_v37, %v3398_v36  ;;  %v3987_v36 = vpack.c.bf16 %v2454_v26, %v2453_v25  ;;  %v2455_v37 = vld [vmem:[%s5765_s12 + $0x10] sm:$0xff]  ;;  %v3425_v25 = vld [vmem:[%s5766_s13 + $0x98] sm:$0xff] }
 0x367   : > { %3354 = vmatmul.mubr.msk.f32.vlgmr.msra.gmra.mrb[8].mxu0 %vm1654_vm9, %v4958_v29  ;;  %3905 = vmatprep.subr.bf16.mxu0 %v3904_v38  ;;  %v3371_v29 = vld [vmem:[%s5760_s7 + $0x288] sm:$0xff] }
 0x368   : > { %3907 = vmatpush1.bf16.msra.mxu0 %v3906_v39  ;;  %1935 = vmatprep.mubr.f32.mxu0 %v4286_v7  ;;  %v3916_v51 = vpack.c.bf16 %v3371_v29, %v3369_v49  ;;  %v3403_v38 = vld [vmem:[%s5760_s7 + $0x368] sm:$0xf]  ;;  %v3402_v39 = vld [vmem:[%s5760_s7 + $0x360] sm:$0xf] }
 0x369   : > { %3909 = vmatprep.subr.bf16.mxu0 %v3908_v40  ;;  %v2180_v40 = vld [vmem:[%s5761_s8] sm:$0x3] }
 0x36a   : > { %v2185_v41 = vrot.slane %v2180_v40, %v1198_v33  ;;  %v2189_v43 = vrot.slane %v2180_v40, %v1202_v35  ;;  %v2360_v35 = vld [vmem:[%s5764_s11] sm:$0xff]  ;;  %v2458_v40 = vld [vmem:[%s5765_s12 + $0x28] sm:$0xff] }
 0x36b   : > { %3355 = vmatmul.mubr.msk.f32.gmra.mrb[10].mxu0 %vm1654_vm9, %v1853_v18  ;;  %v3375_v18 = vld [vmem:[%s5760_s7 + $0x2a8] sm:$0xff] }
 0x36c   : > { %3911 = vmatpush1.bf16.msra.mxu0 %v3910_v45  ;;  %2046 = vmatprep.mubr.f32.mxu0 %v4286_v7  ;;  %v3920_v56 = vpack.c.bf16 %v3375_v18, %v3373_v54  ;;  %v3957_v54 = vpack.c.bf16 %v2361_v52, %v2360_v35  ;;  %v2362_v18 = vld [vmem:[%s5764_s11 + $0x10] sm:$0xff]  ;;  %v2470_v35 = vld [vmem:[%s5765_s12 + $0x88] sm:$0xff] }
 0x36d   : > { %3913 = vmatprep.subr.bf16.mxu0 %v3912_v46 }
 0x370   : > { %3915 = vmatpush1.bf16.msra.mxu0 %v3914_v50 }
 0x371   : > { %3917 = vmatprep.subr.bf16.mxu0 %v3916_v51 }
 0x374   : > { %3919 = vmatpush1.bf16.msra.mxu0 %v3918_v55  ;;  %v2363_v55 = vld [vmem:[%s5764_s11 + $0x18] sm:$0xff] }
 0x375   : > { %3921 = vmatprep.subr.bf16.mxu0 %v3920_v56  ;;  %v3960_v56 = vpack.c.bf16 %v2363_v55, %v2362_v18  ;;  %v2544_v55 = vld [vmem:[%s5766_s13] sm:$0xff] }
 0x378   : > { %3923 = vmatpush1.bf16.msra.mxu0 %v3922_v59  ;;  %v3963_v59 = vpack.c.bf16 %v2365_v58, %v2364_v57  ;;  %v3416_v57 = vld [vmem:[%s5766_s13 + $0x50] sm:$0xff] }
 0x379   : > { %3378 = vmatprep.subr.msk.mxu0 %vm1081_vm2, %v3377_v60  ;;  %v2366_v60 = vld [vmem:[%s5764_s11 + $0x30] sm:$0xff] }
 0x37a   : > { %v3966_v62 = vpack.c.bf16 %v2367_v61, %v2366_v60  ;;  %v2546_v60 = vld [vmem:[%s5766_s13 + $0x10] sm:$0xff]  ;;  %v2547_v61 = vld [vmem:[%s5766_s13 + $0x18] sm:$0xff] }
 0x37c   : > { %3379 = vmatpush1.msk.msra.mxu0 %vm1081_vm2, %v3376_v4  ;;  %v2371_v4 = vld [vmem:[%s5764_s11 + $0x58] sm:$0xff] }
 0x37d   : > { %3380 = vmatmul.mubr.msk.f32.vlgmr.msra.gmra.mrb[8].mxu0 %vm1654_vm9, %v4963_v22  ;;  %3925 = vmatprep.subr.bf16.mxu0 %v3924_v5  ;;  %v3397_v22 = vld [vmem:[%s5760_s7 + $0x338] sm:$0xff]  ;;  %v3972_v5 = vpack.c.bf16 %v2371_v4, %v2370_v3  ;;  %v4020_v3 = vpack.c.bf16 %v3419_v0, %v3418_v63  ;;  %v2548_v4 = vld [vmem:[%s5766_s13 + $0x20] sm:$0xff]  ;;  %v3452_v0 = vld [vmem:[%s5766_s13 + $0x150] sm:$0xff] }
 0x37e   : > { %3927 = vmatpush1.bf16.msra.mxu0 %v3926_v9  ;;  %2052 = vmatprep.mubr.f32.mxu0 %v4286_v7  ;;  %v3936_v24 = vpack.c.bf16 %v3397_v22, %v3395_v21  ;;  %v2372_v9 = vld [vmem:[%s5764_s11 + $0x60] sm:$0xff]  ;;  %v2379_v21 = vld [vmem:[%s5764_s11 + $0x98] sm:$0xff] }
 0x37f   : > { %3929 = vmatprep.subr.bf16.mxu0 %v3928_v1  ;;  %v2373_v1 = vld [vmem:[%s5764_s11 + $0x68] sm:$0xff]  ;;  %v3984_v22 = vpack.c.bf16 %v2379_v21, %v2378_v17  ;;  %v2552_v21 = vld [vmem:[%s5766_s13 + $0x40] sm:$0xff] }
 0x380   : > { %v3975_v10 = vpack.c.bf16 %v2373_v1, %v2372_v9  ;;  %v3420_v9 = vld [vmem:[%s5766_s13 + $0x70] sm:$0xff]  ;;  %v3421_v1 = vld [vmem:[%s5766_s13 + $0x78] sm:$0xff] }
 0x381   : > { %3381 = vmatmul.mubr.msk.f32.gmra.mrb[10].mxu0 %vm1654_vm9, %v1970_v19  ;;  %v3401_v19 = vld [vmem:[%s5760_s7 + $0x358] sm:$0xff]  ;;  %v4023_v11 = vpack.c.bf16 %v3421_v1, %v3420_v9  ;;  %v3456_v1 = vld [vmem:[%s5766_s13 + $0x170] sm:$0xff] }
 0x382   : > { %3931 = vmatpush1.bf16.msra.mxu0 %v3930_v14  ;;  %2163 = vmatprep.mubr.f32.mxu0 %v4286_v7  ;;  %v3940_v34 = vpack.c.bf16 %v3401_v19, %v3399_v27  ;;  %v2376_v14 = vld [vmem:[%s5764_s11 + $0x80] sm:$0xff] }
 0x383   : > { %3933 = vmatprep.subr.bf16.mxu0 %v3932_v15  ;;  %v2377_v15 = vld [vmem:[%s5764_s11 + $0x88] sm:$0xff] }
 0x384   : > { %v3981_v16 = vpack.c.bf16 %v2377_v15, %v2376_v14  ;;  %v3422_v14 = vld [vmem:[%s5766_s13 + $0x80] sm:$0xff]  ;;  %v3423_v15 = vld [vmem:[%s5766_s13 + $0x88] sm:$0xff] }
 0x385   : > { %v4026_v17 = vpack.c.bf16 %v3423_v15, %v3422_v14 }
 0x386   : > { %3935 = vmatpush1.bf16.msra.mxu0 %v3934_v23 }
 0x387   : > { %3937 = vmatprep.subr.bf16.mxu0 %v3936_v24 }
 0x38a   : > { %3939 = vmatpush1.bf16.msra.mxu0 %v3938_v31 }
 0x38b   : > { %3941 = vmatprep.subr.bf16.mxu0 %v3940_v34 }
 0x38e   : > { %3943 = vmatpush1.bf16.msra.mxu0 %v3942_v28  ;;  %v2456_v28 = vld [vmem:[%s5765_s12 + $0x18] sm:$0xff] }
 0x38f   : > { %3404 = vmatprep.subr.msk.mxu0 %vm1081_vm2, %v3403_v38  ;;  %v3990_v38 = vpack.c.bf16 %v2456_v28, %v2455_v37  ;;  %v3429_v37 = vld [vmem:[%s5766_s13 + $0xa8] sm:$0xff] }
 0x392   : > { %3405 = vmatpush1.msk.msra.mxu0 %vm1081_vm2, %v3402_v39  ;;  %v2457_v39 = vld [vmem:[%s5765_s12 + $0x20] sm:$0xff] }
 0x393   : > { %3406 = vmatmul.mubr.msk.f32.vlgmr.msra.gmra.mrb[8].mxu0 %vm1654_vm9, %v4968_v30  ;;  %4016 = vmatprep.subr.bf16.mxu0 %v4288_v8 }
 0x394   : > { %2169 = vmatprep.mubr.f32.mxu0 %v4286_v7 }
 0x397   : > { %3407 = vmatmul.mubr.msk.f32.gmra.mrb[10].mxu0 %vm1654_vm9, %v2087_v20 }
 0x398   : > { %3571 = vmatprep.mubr.msk.f32.mxu0 %vm4289_vm13, %v4286_v7 }
 0x466   : > { %v2165_v42 = vpop.f32.mrb[8].mxu0 }
 0x467   : > { %v2167_v30 = vpop.f32.mrb[9].mxu0  ;;  %v2192_v44 = vadd.f32 %v2185_v41, %v2165_v42  ;;  %v2459_v42 = vld [vmem:[%s5765_s12 + $0x30] sm:$0xff] }
 0x468   : > { %v2193_v45 = vadd.f32 %v2189_v43, %v2167_v30 }
 0x469   : > { %v2196_v20 = vmax.f32 %v2192_v44, 0.0  ;;  %v2461_v44 = vld [vmem:[%s5765_s12 + $0x40] sm:$0xff] }
 0x46a   : > { %v2171_v46 = vpop.f32.mrb[10].mxu0  ;;  %v2197_v29 = vmax.f32 %v2193_v45, 0.0  ;;  %v2462_v45 = vld [vmem:[%s5765_s12 + $0x48] sm:$0xff] }
 0x46b   : > { %v2194_v47 = vadd.f32 %v2185_v41, %v2171_v46  ;;  %v2173_v48 = vpop.f32.mrb[11].mxu0  ;;  %v3993_v41 = vpack.c.bf16 %v2458_v40, %v2457_v39  ;;  %v3999_v46 = vpack.c.bf16 %v2462_v45, %v2461_v44  ;;  %v3430_v44 = vld [vmem:[%s5766_s13 + $0xb0] sm:$0xff]  ;;  %v3431_v45 = vld [vmem:[%s5766_s13 + $0xb8] sm:$0xff] }
 0x46c   : > { %v2195_v6 = vadd.f32 %v2189_v43, %v2173_v48  ;;  %v2460_v43 = vld [vmem:[%s5765_s12 + $0x38] sm:$0xff] }
 0x46d   : > { %v2198_v49 = vmax.f32 %v2194_v47, 0.0  ;;  %v3996_v30 = vpack.c.bf16 %v2460_v43, %v2459_v42  ;;  %v2463_v47 = vld [vmem:[%s5765_s12 + $0x50] sm:$0xff]  ;;  %v2464_v48 = vld [vmem:[%s5765_s12 + $0x58] sm:$0xff]  ;;  %v3442_v42 = vld [vmem:[%s5766_s13 + $0x108] sm:$0xff] }
 0x46e   : > { %v2199_v50 = vmax.f32 %v2195_v6, 0.0  ;;  %v4002_v6 = vpack.c.bf16 %v2464_v48, %v2463_v47  ;;  %v3443_v47 = vld [vmem:[%s5766_s13 + $0x110] sm:$0xff]  ;;  %v3444_v48 = vld [vmem:[%s5766_s13 + $0x118] sm:$0xff] }
 0x46f   : > { %v3947_v51 = vpack.c.bf16 %v2198_v49, %v2196_v20  ;;  %v2465_v20 = vld [vmem:[%s5765_s12 + $0x60] sm:$0xff]  ;;  %v2466_v49 = vld [vmem:[%s5765_s12 + $0x68] sm:$0xff] }
 0x470   : > { %v3944_v33 = vpack.c.bf16 %v2199_v50, %v2197_v29  ;;  %v4005_v29 = vpack.c.bf16 %v2466_v49, %v2465_v20  ;;  %v2467_v50 = vld [vmem:[%s5765_s12 + $0x70] sm:$0xff]  ;;  %v3432_v20 = vld [vmem:[%s5766_s13 + $0xc0] sm:$0xff]  ;;  %v3433_v49 = vld [vmem:[%s5766_s13 + $0xc8] sm:$0xff] }
 0x472   : > { %3946 = vmatprep.subr.msk.bf16.mxu1 %vm3945_vm11, %v3944_v33 }
 0x473   : > { %3949 = vmatpush1.bf16.msk.msra.mxu1 %vm3945_vm11, %v3947_v51 }
 0x474   : > { %3952 = vmatprep.subr.msk.bf16.mxu1 %vm3945_vm11, %v3944_v33 }
 0x476   : > { %3410 = vmatmul.mubr.msk.f32.vlgmr.msra.gmra.mrb[16].mxu1 %vm2201_vm12, %v2200_v32  ;;  %v2469_v32 = vld [vmem:[%s5765_s12 + $0x80] sm:$0xff] }
 0x477   : > { %3955 = vmatpush1.bf16.msk.msra.mxu1 %vm3945_vm11, %v3947_v51  ;;  %2351 = vmatprep.mubr.f32.mxu1 %v4286_v7  ;;  %v2468_v51 = vld [vmem:[%s5765_s12 + $0x78] sm:$0xff]  ;;  %v4011_v52 = vpack.c.bf16 %v2470_v35, %v2469_v32  ;;  %v3434_v32 = vld [vmem:[%s5766_s13 + $0xd0] sm:$0xff] }
 0x478   : > { %3956 = vmatprep.subr.bf16.mxu1 %v4288_v8  ;;  %v4008_v33 = vpack.c.bf16 %v2468_v51, %v2467_v50  ;;  %v3445_v50 = vld [vmem:[%s5766_s13 + $0x120] sm:$0xff]  ;;  %v3446_v51 = vld [vmem:[%s5766_s13 + $0x128] sm:$0xff]  ;;  %v3435_v35 = vld [vmem:[%s5766_s13 + $0xd8] sm:$0xff] }
 0x47a   : > { %3413 = vmatmul.mubr.msk.f32.vlgmr.msra.gmra.mrb[18].mxu1 %vm2201_vm12, %v2283_v53  ;;  %v2471_v53 = vld [vmem:[%s5765_s12 + $0x90] sm:$0xff] }
 0x47b   : > { %3958 = vmatpush1.bf16.msra.mxu1 %v3957_v54  ;;  %v2472_v54 = vld [vmem:[%s5765_s12 + $0x98] sm:$0xff] }
 0x47c   : > { %3959 = vmatprep.subr.bf16.mxu1 %v4288_v8  ;;  %v4014_v18 = vpack.c.bf16 %v2472_v54, %v2471_v53  ;;  %v3447_v53 = vld [vmem:[%s5766_s13 + $0x130] sm:$0xff]  ;;  %v3448_v54 = vld [vmem:[%s5766_s13 + $0x138] sm:$0xff] }
 0x47f   : > { %3961 = vmatpush1.bf16.msra.mxu1 %v3960_v56  ;;  %v2545_v56 = vld [vmem:[%s5766_s13 + $0x8] sm:$0xff] }
 0x480   : > { %3962 = vmatprep.subr.bf16.mxu1 %v4288_v8  ;;  %v4032_v58 = vpack.c.bf16 %v2545_v56, %v2544_v55  ;;  %v3436_v55 = vld [vmem:[%s5766_s13 + $0xe0] sm:$0xff]  ;;  %v3437_v56 = vld [vmem:[%s5766_s13 + $0xe8] sm:$0xff] }
 0x483   : > { %3964 = vmatpush1.bf16.msra.mxu1 %v3963_v59  ;;  %v3417_v59 = vld [vmem:[%s5766_s13 + $0x58] sm:$0xff] }
 0x484   : > { %3965 = vmatprep.subr.bf16.mxu1 %v4288_v8 }
 0x487   : > { %3967 = vmatpush1.bf16.msra.mxu1 %v3966_v62  ;;  %v4017_v62 = vpack.c.bf16 %v3417_v59, %v3416_v57  ;;  %v4074_v57 = vpack.c.bf16 %v3448_v54, %v3447_v53  ;;  %v3450_v59 = vld [vmem:[%s5766_s13 + $0x140] sm:$0xff] }
 0x488   : > { %3968 = vmatprep.subr.bf16.mxu1 %v4288_v8 }
 0x489   : > { %4018 = vmatpush3.bf16.msra.mxu0 %v4017_v62 }
 0x48a   : > { %4019 = vmatprep.subr.bf16.mxu0 %v4288_v8 }
 0x48b   : > { %3970 = vmatpush1.bf16.msra.mxu1 %v3969_v2  ;;  %v4035_v2 = vpack.c.bf16 %v2547_v61, %v2546_v60  ;;  %v3451_v60 = vld [vmem:[%s5766_s13 + $0x148] sm:$0xff] }
 0x48c   : > { %3971 = vmatprep.subr.bf16.mxu1 %v4288_v8  ;;  %v4077_v62 = vpack.c.bf16 %v3451_v60, %v3450_v59 }
 0x48d   : > { %4021 = vmatpush3.bf16.msra.mxu0 %v4020_v3 }
 0x48e   : > { %4022 = vmatprep.subr.bf16.mxu0 %v4288_v8 }
 0x48f   : > { %3973 = vmatpush1.bf16.msra.mxu1 %v3972_v5  ;;  %v2549_v5 = vld [vmem:[%s5766_s13 + $0x28] sm:$0xff] }
 0x490   : > { %3974 = vmatprep.subr.bf16.mxu1 %v4288_v8 }
 0x491   : > { %4024 = vmatpush3.bf16.msra.mxu0 %v4023_v11 }
 0x492   : > { %4025 = vmatprep.subr.bf16.mxu0 %v4288_v8 }
 0x493   : > { %3976 = vmatpush1.bf16.msra.mxu1 %v3975_v10  ;;  %v4038_v10 = vpack.c.bf16 %v2549_v5, %v2548_v4  ;;  %v3454_v4 = vld [vmem:[%s5766_s13 + $0x160] sm:$0xff]  ;;  %v3455_v5 = vld [vmem:[%s5766_s13 + $0x168] sm:$0xff] }
 0x494   : > { %3977 = vmatprep.subr.bf16.mxu1 %v4288_v8  ;;  %v4083_v9 = vpack.c.bf16 %v3455_v5, %v3454_v4  ;;  %v3071_v5 = vld [vmem:[%s5770_s17 + $0x50] sm:$0xf] }
 0x495   : > { %4027 = vmatpush3.bf16.msra.mxu0 %v4026_v17  ;;  %v2971_v17 = vld [vmem:[%s5768_s15 + $0x8] sm:$0xff] }
 0x496   : > { %4028 = vmatprep.subr.bf16.mxu0 %v4288_v8 }
 0x497   : > { %3979 = vmatpush1.bf16.msra.mxu1 %v3978_v13  ;;  %v2551_v13 = vld [vmem:[%s5766_s13 + $0x38] sm:$0xff] }
 0x498   : > { %3980 = vmatprep.subr.bf16.mxu1 %v4288_v8 }
 0x49b   : > { %3982 = vmatpush1.bf16.msra.mxu1 %v3981_v16  ;;  %v4041_v16 = vpack.c.bf16 %v2551_v13, %v2550_v12  ;;  %v3458_v12 = vld [vmem:[%s5766_s13 + $0x180] sm:$0xff]  ;;  %v3459_v13 = vld [vmem:[%s5766_s13 + $0x188] sm:$0xff] }
 0x49c   : > { %3983 = vmatprep.subr.bf16.mxu1 %v4288_v8  ;;  %v4089_v14 = vpack.c.bf16 %v3459_v13, %v3458_v12 }
 0x49f   : > { %3985 = vmatpush1.bf16.msra.mxu1 %v3984_v22  ;;  %v2553_v22 = vld [vmem:[%s5766_s13 + $0x48] sm:$0xff] }
 0x4a0   : > { %3986 = vmatprep.subr.bf16.mxu1 %v4288_v8 }
 0x549   : > { %v2278_v23 = vpop.f32.mrb[16].mxu1 }
 0x54a   : > { %v2280_v24 = vpop.f32.mrb[17].mxu1 }
 0x54d   : > { %v2353_v27 = vpop.f32.mrb[18].mxu1 }
 0x54e   : > { %v2358_v19 = vmax.f32 %v2278_v23, %v2353_v27  ;;  %v2355_v31 = vpop.f32.mrb[19].mxu1  ;;  %v4044_v23 = vpack.c.bf16 %v2553_v22, %v2552_v21  ;;  %v2972_v22 = vld [vmem:[%s5768_s15 + $0x10] sm:$0xff] }
 0x54f   : > { %v2359_v34 = vmax.f32 %v2280_v24, %v2355_v31  ;;  %v3424_v24 = vld [vmem:[%s5766_s13 + $0x90] sm:$0xff] }
 0x550   : > { %v4029_v26 = vpack.c.bf16 %v3425_v25, %v3424_v24  ;;  %v3439_v31 = vld [vmem:[%s5766_s13 + $0xf0] sm:$0xff]  ;;  %v2974_v25 = vld [vmem:[%s5768_s15 + $0x20] sm:$0xff] }
 0x551   : > { %3414 = vmatprep.mubr.msk.f32.mxu1 %vm633_vm1, %v2359_v34 }
 0x552   : > { %2448 = vmatmul.mubr.f32.vlgmr.msra.gmra.mrb[20].mxu1 %v2358_v19  ;;  %4030 = vmatpush3.bf16.msra.mxu0 %v4029_v26  ;;  %v2975_v26 = vld [vmem:[%s5768_s15 + $0x28] sm:$0xff] }
 0x553   : > { %3988 = vmatpush1.bf16.msra.mxu1 %v3987_v36  ;;  %3415 = vmatprep.mubr.msk.f32.mxu1 %vm633_vm1, %v2359_v34  ;;  %v3440_v34 = vld [vmem:[%s5766_s13 + $0xf8] sm:$0xff]  ;;  %v3428_v36 = vld [vmem:[%s5766_s13 + $0xa0] sm:$0xff] }
 0x554   : > { %3989 = vmatprep.subr.bf16.mxu1 %v4288_v8  ;;  %4046 = vmatprep.subr.bf16.mxu0 %v4288_v8  ;;  %v4047_v43 = vpack.c.bf16 %v3429_v37, %v3428_v36  ;;  %v2978_v36 = vld [vmem:[%s5768_s15 + $0x40] sm:$0xff]  ;;  %v2979_v37 = vld [vmem:[%s5768_s15 + $0x48] sm:$0xff] }
 0x557   : > { %3991 = vmatpush1.bf16.msra.mxu1 %v3990_v38  ;;  %v4062_v38 = vpack.c.bf16 %v3440_v34, %v3439_v31  ;;  %v2977_v31 = vld [vmem:[%s5768_s15 + $0x38] sm:$0xff] }
 0x558   : > { %3992 = vmatprep.subr.bf16.mxu1 %v4288_v8 }
 0x55b   : > { %3994 = vmatpush1.bf16.msra.mxu1 %v3993_v41  ;;  %v3441_v41 = vld [vmem:[%s5766_s13 + $0x100] sm:$0xff] }
 0x55c   : > { %3995 = vmatprep.subr.bf16.mxu1 %v4288_v8 }
 0x55f   : > { %3997 = vmatpush1.bf16.msra.mxu1 %v3996_v30 }
 0x560   : > { %3998 = vmatprep.subr.bf16.mxu1 %v4288_v8 }
 0x563   : > { %4000 = vmatpush1.bf16.msra.mxu1 %v3999_v46  ;;  %v4065_v46 = vpack.c.bf16 %v3442_v42, %v3441_v41  ;;  %v2982_v41 = vld [vmem:[%s5768_s15 + $0x60] sm:$0xff]  ;;  %v2983_v42 = vld [vmem:[%s5768_s15 + $0x68] sm:$0xff] }
 0x564   : > { %4001 = vmatprep.subr.bf16.mxu1 %v4288_v8 }
 0x567   : > { %4003 = vmatpush1.bf16.msra.mxu1 %v4002_v6  ;;  %v4050_v6 = vpack.c.bf16 %v3431_v45, %v3430_v44  ;;  %v3061_v44 = vld [vmem:[%s5770_s17] sm:$0xff]  ;;  %v3062_v45 = vld [vmem:[%s5770_s17 + $0x8] sm:$0xff] }
 0x568   : > { %4004 = vmatprep.subr.bf16.mxu1 %v4288_v8 }
 0x56b   : > { %4006 = vmatpush1.bf16.msra.mxu1 %v4005_v29  ;;  %v4068_v29 = vpack.c.bf16 %v3444_v48, %v3443_v47  ;;  %v4113_v47 = vpack.c.bf16 %v3062_v45, %v3061_v44  ;;  %v3064_v48 = vld [vmem:[%s5770_s17 + $0x18] sm:$0xff] }
 0x56c   : > { %4007 = vmatprep.subr.bf16.mxu1 %v4288_v8 }
 0x56f   : > { %4009 = vmatpush1.bf16.msra.mxu1 %v4008_v33  ;;  %v4053_v33 = vpack.c.bf16 %v3433_v49, %v3432_v20  ;;  %v3065_v20 = vld [vmem:[%s5770_s17 + $0x20] sm:$0xff]  ;;  %v3066_v49 = vld [vmem:[%s5770_s17 + $0x28] sm:$0xff] }
 0x570   : > { %4010 = vmatprep.subr.bf16.mxu1 %v4288_v8 }
 0x573   : > { %4012 = vmatpush1.bf16.msra.mxu1 %v4011_v52  ;;  %v4071_v52 = vpack.c.bf16 %v3446_v51, %v3445_v50  ;;  %v3067_v50 = vld [vmem:[%s5770_s17 + $0x30] sm:$0xff]  ;;  %v3068_v51 = vld [vmem:[%s5770_s17 + $0x38] sm:$0xff] }
 0x574   : > { %4013 = vmatprep.subr.bf16.mxu1 %v4288_v8 }
 0x577   : > { %4015 = vmatpush1.bf16.msra.mxu1 %v4014_v18  ;;  %v4056_v18 = vpack.c.bf16 %v3435_v35, %v3434_v32 }
 0x578   : > { %4031 = vmatprep.subr.bf16.mxu1 %v4288_v8 }
 0x57a   : > { %2538 = vmatmul.mubr.f32.vlgmr.msra.gmra.mrb[22].mxu1 %v2358_v19 }
 0x57b   : > { %4033 = vmatpush3.bf16.msra.mxu1 %v4032_v58  ;;  %3594 = vmatprep.mubr.msk.f32.mxu1 %vm4289_vm13, %v4286_v7  ;;  %v4059_v58 = vpack.c.bf16 %v3437_v56, %v3436_v55 }
 0x57c   : > { %4034 = vmatprep.subr.bf16.mxu1 %v4288_v8 }
 0x57f   : > { %4036 = vmatpush3.bf16.msra.mxu1 %v4035_v2  ;;  %v3453_v2 = vld [vmem:[%s5766_s13 + $0x158] sm:$0xff] }
 0x580   : > { %4037 = vmatprep.subr.bf16.mxu1 %v4288_v8  ;;  %v4080_v3 = vpack.c.bf16 %v3453_v2, %v3452_v0  ;;  %v3069_v2 = vld [vmem:[%s5770_s17 + $0x40] sm:$0xff] }
 0x583   : > { %4039 = vmatpush3.bf16.msra.mxu1 %v4038_v10  ;;  %v3457_v10 = vld [vmem:[%s5766_s13 + $0x178] sm:$0xff] }
 0x584   : > { %4040 = vmatprep.subr.bf16.mxu1 %v4288_v8  ;;  %v4086_v11 = vpack.c.bf16 %v3457_v10, %v3456_v1 }
 0x587   : > { %4042 = vmatpush3.bf16.msra.mxu1 %v4041_v16  ;;  %v2970_v16 = vld [vmem:[%s5768_s15] sm:$0xff] }
 0x588   : > { %4043 = vmatprep.subr.bf16.mxu1 %v4288_v8  ;;  %v4092_v21 = vpack.c.bf16 %v2971_v17, %v2970_v16 }
 0x58b   : > { %4045 = vmatpush3.bf16.msra.mxu1 %v4044_v23  ;;  %v2973_v23 = vld [vmem:[%s5768_s15 + $0x18] sm:$0xff] }
 0x58c   : > { %4061 = vmatprep.subr.bf16.mxu1 %v4288_v8  ;;  %v4095_v24 = vpack.c.bf16 %v2973_v23, %v2972_v22 }
 0x625   : > { %v2449_v27 = vpop.f32.mrb[20].mxu1 }
 0x626   : > { %v2451_v19 = vpop.f32.mrb[21].mxu1 }
 0x627   : > { %v2976_v19 = vld [vmem:[%s5768_s15 + $0x30] sm:$0xff] }
 0x628   : > { %v4101_v34 = vpack.c.bf16 %v2977_v31, %v2976_v19 }
 0x64d   : > { %v2539_v28 = vpop.f32.mrb[22].mxu1 }
 0x64e   : > { %v5487_v39 = vmax.f32 %v2449_v27, %v2539_v28  ;;  %v2541_v40 = vpop.f32.mrb[23].mxu1  ;;  %v4098_v27 = vpack.c.bf16 %v2975_v26, %v2974_v25  ;;  %v4104_v28 = vpack.c.bf16 %v2979_v37, %v2978_v36 }
 0x650   : > { %v2566_v30 = vrot.slane %v5487_v39, 1  ;;  %3595 = vmatmul.mubr.msk.f32.vlgmr.msra.gmra.mrb[24].mxu1 %vm2567_vm14, %v5487_v39  ;;  %v2808_v61 = vrot.slane %v5487_v39, 3  ;;  %v2723_v63 = vrot.slane %v5487_v39, 2  ;;  %v2893_v15 = vrot.slane %v5487_v39, 4  ;;  %v2981_v39 = vld [vmem:[%s5768_s15 + $0x58] sm:$0xff] }
 0x651   : > { %4063 = vmatpush3.bf16.msra.mxu1 %v4062_v38  ;;  %3640 = vmatprep.mubr.msk.f32.mxu1 %vm4289_vm13, %v4286_v7  ;;  %v2980_v38 = vld [vmem:[%s5768_s15 + $0x50] sm:$0xff] }
 0x652   : > { %3572 = vmatmul.mubr.msk.f32.vlgmr.msra.gmra.mrb[12].mxu0 %vm2567_vm14, %v2566_v30  ;;  %4064 = vmatprep.subr.bf16.mxu1 %v4288_v8  ;;  %v4107_v40 = vpack.c.bf16 %v2981_v39, %v2980_v38  ;;  %v2984_v30 = vld [vmem:[%s5768_s15 + $0x70] sm:$0xff] }
 0x653   : > { %4048 = vmatpush3.bf16.msra.mxu0 %v4047_v43  ;;  %3617 = vmatprep.mubr.msk.f32.mxu0 %vm4289_vm13, %v4286_v7  ;;  %v4110_v43 = vpack.c.bf16 %v2983_v42, %v2982_v41 }
 0x654   : > { %4049 = vmatprep.subr.bf16.mxu0 %v4288_v8 }
 0x655   : > { %4066 = vmatpush3.bf16.msra.mxu1 %v4065_v46  ;;  %v3063_v46 = vld [vmem:[%s5770_s17 + $0x10] sm:$0xff] }
 0x656   : > { %4067 = vmatprep.subr.bf16.mxu1 %v4288_v8 }
 0x657   : > { %4051 = vmatpush3.bf16.msra.mxu0 %v4050_v6  ;;  %v4116_v6 = vpack.c.bf16 %v3064_v48, %v3063_v46 }
 0x658   : > { %4052 = vmatprep.subr.bf16.mxu0 %v4288_v8 }
 0x659   : > { %4069 = vmatpush3.bf16.msra.mxu1 %v4068_v29  ;;  %v4119_v29 = vpack.c.bf16 %v3066_v49, %v3065_v20 }
 0x65a   : > { %4070 = vmatprep.subr.bf16.mxu1 %v4288_v8 }
 0x65b   : > { %4054 = vmatpush3.bf16.msra.mxu0 %v4053_v33  ;;  %v4122_v33 = vpack.c.bf16 %v3068_v51, %v3067_v50 }
 0x65c   : > { %4055 = vmatprep.subr.bf16.mxu0 %v4288_v8 }
 0x65d   : > { %4072 = vmatpush3.bf16.msra.mxu1 %v4071_v52 }
 0x65e   : > { %4073 = vmatprep.subr.bf16.mxu1 %v4288_v8 }
 0x65f   : > { %4057 = vmatpush3.bf16.msra.mxu0 %v4056_v18 }
 0x660   : > { %4058 = vmatprep.subr.bf16.mxu0 %v4288_v8 }
 0x661   : > { %4075 = vmatpush3.bf16.msra.mxu1 %v4074_v57 }
 0x662   : > { %4091 = vmatprep.subr.bf16.mxu1 %v4288_v8 }
 0x663   : > { %4060 = vmatpush3.bf16.msra.mxu0 %v4059_v58 }
 0x664   : > { %3641 = vmatmul.mubr.msk.f32.vlgmr.msra.gmra.mrb[26].mxu1 %vm2567_vm14, %v2808_v61  ;;  %4076 = vmatprep.subr.bf16.mxu0 %v4288_v8  ;;  %v2967_v61 = vld [vmem:[%s5767_s14] sm:$0x1] }
 0x665   : > { %3696 = vmatprep.mubr.msk.f32.mxu1 %vm4289_vm13, %v4286_v7  ;;  %4093 = vmatpush3.bf16.msra.mxu1 %v4092_v21 }
 0x666   : > { %3618 = vmatmul.mubr.msk.f32.vlgmr.msra.gmra.mrb[14].mxu0 %vm2567_vm14, %v2723_v63  ;;  %4094 = vmatprep.subr.bf16.mxu1 %v4288_v8 }
 0x667   : > { %4078 = vmatpush3.bf16.msra.mxu0 %v4077_v62  ;;  %3663 = vmatprep.mubr.msk.f32.mxu0 %vm4289_vm13, %v4286_v7 }
 0x668   : > { %4079 = vmatprep.subr.bf16.mxu0 %v4288_v8 }
 0x669   : > { %4096 = vmatpush3.bf16.msra.mxu1 %v4095_v24 }
 0x66a   : > { %4097 = vmatprep.subr.bf16.mxu1 %v4288_v8 }
 0x66b   : > { %4081 = vmatpush3.bf16.msra.mxu0 %v4080_v3  ;;  %v3070_v3 = vld [vmem:[%s5770_s17 + $0x48] sm:$0xff] }
 0x66c   : > { %4082 = vmatprep.subr.bf16.mxu0 %v4288_v8  ;;  %v4125_v4 = vpack.c.bf16 %v3070_v3, %v3069_v2 }
 0x66d   : > { %4099 = vmatpush3.bf16.msra.mxu1 %v4098_v27 }
 0x66e   : > { %4100 = vmatprep.subr.bf16.mxu1 %v4288_v8 }
 0x66f   : > { %4084 = vmatpush3.bf16.msra.mxu0 %v4083_v9  ;;  %v2985_v9 = vld [vmem:[%s5769_s16] sm:$0x1] }
 0x670   : > { %4085 = vmatprep.subr.bf16.mxu0 %v4288_v8 }
 0x671   : > { %4102 = vmatpush3.bf16.msra.mxu1 %v4101_v34 }
 0x672   : > { %4103 = vmatprep.subr.bf16.mxu1 %v4288_v8 }
 0x673   : > { %4087 = vmatpush3.bf16.msra.mxu0 %v4086_v11 }
 0x674   : > { %4088 = vmatprep.subr.bf16.mxu0 %v4288_v8 }
 0x675   : > { %4105 = vmatpush3.bf16.msra.mxu1 %v4104_v28 }
 0x676   : > { %4106 = vmatprep.subr.bf16.mxu1 %v4288_v8 }
 0x677   : > { %4090 = vmatpush3.bf16.msra.mxu0 %v4089_v14 }
 0x678   : > { %4112 = vmatprep.subr.bf16.mxu0 %v4288_v8 }
 0x679   : > { %4108 = vmatpush3.bf16.msra.mxu1 %v4107_v40 }
 0x67a   : > { %3664 = vmatmul.mubr.msk.f32.vlgmr.msra.gmra.mrb[16].mxu0 %vm2567_vm14, %v2893_v15  ;;  %4109 = vmatprep.subr.bf16.mxu1 %v4288_v8 }
 0x67b   : > { %3721 = vmatprep.mubr.msk.f32.mxu0 %vm4289_vm13, %v4286_v7  ;;  %4114 = vmatpush3.bf16.msra.mxu0 %v4113_v47 }
 0x67c   : > { %4115 = vmatprep.subr.bf16.mxu0 %v4288_v8 }
 0x67d   : > { %4111 = vmatpush3.bf16.msra.mxu1 %v4110_v43 }
 0x67e   : > { %3694 = vmatprep.subr.mxu1 %v4286_v7 }
 0x67f   : > { %4117 = vmatpush3.bf16.msra.mxu0 %v4116_v6 }
 0x680   : > { %4118 = vmatprep.subr.bf16.mxu0 %v4288_v8 }
 0x681   : > { %3695 = vmatpush3.msra.mxu1 %v2984_v30 }
 0x683   : > { %4120 = vmatpush3.bf16.msra.mxu0 %v4119_v29 }
 0x684   : > { %4121 = vmatprep.subr.bf16.mxu0 %v4288_v8 }
 0x687   : > { %4123 = vmatpush3.bf16.msra.mxu0 %v4122_v33 }
 0x688   : > { %4124 = vmatprep.subr.bf16.mxu0 %v4288_v8 }
 0x68b   : > { %4126 = vmatpush3.bf16.msra.mxu0 %v4125_v4 }
 0x68c   : > { %3719 = vmatprep.subr.mxu0 %v4286_v7  ;;  %v3072_v7 = vld [vmem:[%s5771_s18] sm:$0x1] }
 0x68f   : > { %3720 = vmatpush3.msk.msra.mxu0 %vm1081_vm2, %v3071_v5 }
 0x723   : > { %v2708_v32 = vpop.f32.mrb[24].mxu1 }
 0x724   : > { %v3596_v35 = vpop.f32.mrb[25].mxu1 }
 0x725   : > { %v2636_v52 = vpop.f32.mrb[12].mxu0 }
 0x726   : > { %v2709_v53 = vadd.f32 %v2708_v32, %v2636_v52  ;;  %v3573_v54 = vpop.f32.mrb[13].mxu0 }
 0x737   : > { %v2877_v18 = vpop.f32.mrb[26].mxu1 }
 0x738   : > { %v3642_v55 = vpop.f32.mrb[27].mxu1 }
 0x739   : > { %v2792_v56 = vpop.f32.mrb[14].mxu0 }
 0x73a   : > { %v2796_v57 = vadd.f32 %v2792_v56, %v2709_v53  ;;  %v3619_v58 = vpop.f32.mrb[15].mxu0 }
 0x73c   : > { %v2881_v59 = vadd.f32 %v2877_v18, %v2796_v57 }
 0x74d   : > { %v2962_v60 = vpop.f32.mrb[16].mxu0 }
 0x74e   : > { %v2966_v62 = vadd.f32 %v2962_v60, %v2881_v59  ;;  %v3665_v63 = vpop.f32.mrb[17].mxu0 }
 0x750   : > { %v2968_v0 = vadd.f32 %v2967_v61, %v2966_v62 }
 0x752   : > { %v2969_v8 = vmax.f32 %v2968_v0, 0.0 }
 0x754   : > { %3697 = vmatmul.mubr.msk.f32.vlgmr.msra.gmra.mrb[28].mxu1 %vm2986_vm15, %v2969_v8 }
 0x827   : > { %v3056_v1 = vpop.f32.mrb[28].mxu1 }
 0x828   : > { %v3057_v10 = vadd.f32 %v3056_v1, %v2985_v9  ;;  %v3698_v11 = vpop.f32.mrb[29].mxu1 }
 0x82a   : > { %v3060_v12 = vmax.f32 %v3057_v10, 0.0 }
 0x82c   : > { %3722 = vmatmul.mubr.msk.f32.vlgmr.msra.gmra.mrb[18].mxu0 %vm1654_vm9, %v3060_v12 }
 0x8ff   : > { %v3145_v13 = vpop.f32.mrb[18].mxu0 }
 0x900   : > { %v3146_v14 = vadd.f32 %v3145_v13, %v3072_v7  ;;  %v3723_v15 = vpop.f32.mrb[19].mxu0 }
 0x902   : > { %v3150_v16 = vsel %vm3149_vm0, %v3146_v14, -inf }
 0x903   : > { %3151 = vmax.xlane.f32.xlu0 %v3150_v16 }
 0x990   : > { %v3152_v17 = vpop.xlane.xlu0 %3151 }
 0x991   : > { %v3153_v21 = vsub.f32 %v3146_v14, %v3152_v17 }
 0x993   : > { %v3154_v22 = vmul.f32 1.442695, %v3153_v21 }
 0x995   : > { %4218 = vpow2.f32 %v3154_v22 }
 0x99f   : > { %v4219_v23 = vpop.eup %4218 }
 0x9a0   : > { %v3156_v24 = vsel %vm3149_vm0, %v4219_v23, 0.0 }
 0x9a1   : > { %3157 = vadd.xlane.f32.xlu0 %v3156_v24 }
 0xa2e   : > { %v3158_v25 = vpop.xlane.xlu0 %3157 }
 0xa2f   : > { %4220 = vrcp.f32 %v3158_v25 }
 0xa39   : > { %v4221_v26 = vpop.eup %4220 }
 0xa3a   : > { %v3160_v27 = vmul.f32 %v4221_v26, %v4219_v23 }
 0xa3c   : > { %3161 = vst.msk [vmem:[%s594_s0] sm:$0x1] %vm3149_vm0, %v3160_v27 }
 0xa3d   : > { %4235 = shalt.err (!%p4232_p3)
}
 0xa3e   : > { %s4236_s24 = scalar_lea.hbm %s5710_s22, 16  ;;  %s4240_s3 = scalar_lea.hbm %s5805_s25, 32 }
 0xa3f   : > { %p4237_p4 = scmp.ne.s32.totalorder %s5710_s22, %s4236_s24  ;;  %p4241_p9 = scmp.lt.u32.totalorder %s5710_s22, %s5805_s25 }
 0xa40   : > { %p4242_p10 = scmp.lt.u32.totalorder %s4240_s3, %s4236_s24  ;;  %p4244_p12 = scmp.lt.u32.totalorder %s4236_s24, %s5710_s22 }
 0xa41   : > { %p4238_p7 = pnand %p4237_p4, %p4429_p5 }
 0xa42   : > { %p4243_p11 = por %p4242_p10, %p4241_p9 }
 0xa43   : > { %p4239_p8 = pneg %p4238_p7 }
 0xa44   : > { %p4245_p13 = por %p4244_p12, %p4243_p11 }
 0xa46   : > { %p4246_p0 = pnand %p4245_p13, %p4239_p8 }
 0xa48   : > { %4249 = shalt.err (!%p4246_p0)
}
 0xa49   : > { %4175 = dma.vmem_to_hbm [thread:$0]  (%p4429_p5), %s5712_s21, 16, %s5710_s22, %s3163_s20  }
 0xa4a PF: > { %s5806_s2 = sld [smem:[#allocation7_spill]]  ;;  %s5807_s26 = sld [smem:[#allocation5_spill]] }
 0xa50   : > { %p4181_p1 = scmp.ge.s32.totalorder %s5806_s2, 2  ;;  %s3187_s27 = sand.u32 1, %s5807_s26  }
 0xa51   : > { %s3188_s0 = scalar_lea.sflag [#allocation3], %s3187_s27 }
 0xa52   : > { %p4178_p2 = pnand %p4181_p1, %p4433_p6 }
 0xa54   : > { %4267 = dma.done.wait (!%p4178_p2), %s3188_s0, 16  }
 0xa55   : > { %4269 = vsyncadd (!%p4178_p2), %s3188_s0, 4294967280  ;;  %s5809_s21 = sld [smem:[#allocation8_spill]]  ;;  %s5810_s24 = sld [smem:[#allocation6_spill]] }
 0xa56   : > { %s5811_s20 = sld [smem:[#allocation9_spill]]  ;;  %s5812_s0 = smov %s4276_s30 }
 0xa5b   : > { %p29_p3 = scmp.ge.s32.totalorder %s5809_s21, 4   ;;  %s5813_s30 = smov %s5810_s24 }
 0xa5d   :  { %31 = sbr.rel (!%p29_p3) target bundleno = 9 (0x9), region = 143 }
 0xa64   :  { %3192 = vsyncpa [#allocation3], 1 }
 0xa65   :  { %3194 = vsyncpa [#allocation3 + $0x1], 1 }

</bundles_post_ra>
